<compile_context>
chip_gen: v5e
topology: v5e:2x2
jax: 0.10.0
libtpu: 0.0.40
codegen_flags: <defaults>
</compile_context>

<pallas_src>
import jax
import jax.numpy as jnp
from jax import lax
from jax.experimental import pallas as pl
from jax.experimental.pallas import tpu as pltpu

HIDDEN_SIZE = 50
INPUT_SIZE = 1
OUTPUT_SIZE = 1
H_PAD = 128                      # one full lane block per gate


def _lstm_fc_kernel(x_ref, wih_ref, bias_ref, whh_ref, wfc_ref, out_ref):
    # x_ref   : (T, B, 1)    raw inputs (input_size == 1)
    # wih_ref : (1, 4*HP)    W_ih row, sigmoid 0.5-pre-scale folded in, lane-padded
    # bias_ref: (1, 4*HP)    (b_ih + b_hh), same pre-scale, lane-padded
    # whh_ref : (HP, 4*HP)   W_hh^T, same pre-scale, row- and lane-padded
    # wfc_ref : (1, HP)      fc weight, lane-padded; lane HP-1 holds the fc bias
    # out_ref : (B, 1)
    T = x_ref.shape[0]
    B = x_ref.shape[1]
    HP = whh_ref.shape[0]

    # Loop-invariant loads, hoisted out of the recurrence.
    wih = wih_ref[...]                       # (1, 4*HP)
    bias = bias_ref[...]                     # (1, 4*HP)
    whh = whh_ref[...]                       # (HP, 4*HP) ~ 256 KiB f32, resident
    wfc = wfc_ref[...]                       # (1, HP)

    # Loop-invariant gate-activation affine vectors (built ONCE above the loop;
    # JAX does not CSE broadcast_in_dim, so building them in `step` would
    # re-emit them T times).  For i/f/o lanes: sigmoid(z) = 0.5*tanh(0.5 z)+0.5
    # with the 0.5 pre-scale already folded into wih/bias/whh; for g lanes the
    # tanh passes through unchanged.
    lane = lax.broadcasted_iota(jnp.int32, (1, 4 * HP), 1)
    is_g = (lane >= 2 * HP) & (lane < 3 * HP)
    post_scale = jnp.where(is_g, 1.0, 0.5).astype(jnp.float32)
    post_offset = jnp.where(is_g, 0.0, 0.5).astype(jnp.float32)

    def step(t, carry):
        h, c = carry
        x_t = x_ref[t]                                            # (B, 1)
        # Input projection = scalar-broadcast FMA (input_size == 1), plus the
        # recurrent matmul (f32 operands, f32 accumulation).
        gates = x_t * wih + bias + jnp.dot(
            h, whh, preferred_element_type=jnp.float32)           # (B, 4*HP)
        # Single fused EUP dispatch for all four gate nonlinearities.
        act = jnp.tanh(gates) * post_scale + post_offset
        i_g = act[:, 0 * HP:1 * HP]
        f_g = act[:, 1 * HP:2 * HP]
        g_g = act[:, 2 * HP:3 * HP]
        o_g = act[:, 3 * HP:4 * HP]
        c_new = f_g * c + i_g * g_g
        h_new = o_g * jnp.tanh(c_new)
        return (h_new, c_new)

    h0 = jnp.zeros((B, HP), jnp.float32)
    c0 = jnp.zeros((B, HP), jnp.float32)
    h_T, _ = lax.fori_loop(0, T, step, (h0, c0), unroll=True)

    # Final linear head on h_T (== final_hidden_state[-1]).  Padded lanes of
    # h_T are exactly 0, so the fc bias stored in lane HP-1 of wfc does not
    # perturb the reduction; it is extracted separately and added.
    bfc = wfc[:, HP - 1:HP]                                       # (1, 1)
    out_ref[...] = jnp.sum(h_T * wfc, axis=-1, keepdims=True) + bfc


def _pad_gate_lanes(m, h, hp):
    """(..., 4h) -> (..., 4hp): gate g moved to lanes [g*hp, g*hp + h), rest zero."""
    lead = m.shape[:-1]
    m4 = m.reshape(lead + (4, h))
    m4 = jnp.pad(m4, [(0, 0)] * len(lead) + [(0, 0), (0, hp - h)])
    return m4.reshape(lead + (4 * hp,))


def init_params(key, input_size=INPUT_SIZE, hidden_size=HIDDEN_SIZE,
                output_size=OUTPUT_SIZE):
    """Deterministic parameter init (mimics PyTorch uniform(-1/sqrt(H), 1/sqrt(H)))."""
    ks = jax.random.split(key, 6)
    bound = 1.0 / jnp.sqrt(jnp.float32(hidden_size))
    u = lambda k, shape: jax.random.uniform(k, shape, jnp.float32, -bound, bound)
    return {
        "w_ih": u(ks[0], (4 * hidden_size, input_size)),   # PyTorch weight_ih_l0
        "w_hh": u(ks[1], (4 * hidden_size, hidden_size)),  # PyTorch weight_hh_l0
        "b_ih": u(ks[2], (4 * hidden_size,)),
        "b_hh": u(ks[3], (4 * hidden_size,)),
        "w_fc": u(ks[4], (output_size, hidden_size)),      # nn.Linear weight
        "b_fc": u(ks[5], (output_size,)),
    }


def prepare_params(params, h_pad=H_PAD):
    """One-time parameter reshuffle: done once, NOT per forward call."""
    H = params["w_hh"].shape[1]
    assert params["w_ih"].shape[1] == 1, "kernel is specialized to input_size == 1"
    assert params["w_fc"].shape[0] == 1, "kernel is specialized to output_size == 1"
    assert H < h_pad, "need a spare padded lane to stash the fc bias"

    # Fold the sigmoid argument scale (sigmoid(z) = 0.5*tanh(0.5 z)+0.5) into
    # the i/f/o gate columns of all pre-activation weights/bias; g gate keeps 1.
    gate_scale = jnp.concatenate([
        jnp.full((H,), 0.5), jnp.full((H,), 0.5),
        jnp.full((H,), 1.0), jnp.full((H,), 0.5)]).astype(jnp.float32)   # (4H,)

    wih_row = (params["w_ih"][:, 0].astype(jnp.float32) * gate_scale)[None, :]   # (1, 4H)
    bias_row = ((params["b_ih"] + params["b_hh"]).astype(jnp.float32)
                * gate_scale)[None, :]                                            # (1, 4H)
    whh_t = params["w_hh"].T.astype(jnp.float32) * gate_scale[None, :]            # (H, 4H)

    wih_pad = _pad_gate_lanes(wih_row, H, h_pad)                     # (1, 4*HP)
    bias_pad = _pad_gate_lanes(bias_row, H, h_pad)                   # (1, 4*HP)
    whh_pad = _pad_gate_lanes(whh_t, H, h_pad)                       # (H, 4*HP)
    whh_pad = jnp.pad(whh_pad, ((0, h_pad - H), (0, 0)))             # (HP, 4*HP)

    # fc weight lane-padded; stash the fc bias in the last (always-zero-h) lane.
    wfc_pad = jnp.pad(params["w_fc"].astype(jnp.float32),
                      ((0, 0), (0, h_pad - H)))                      # (1, HP)
    wfc_pad = wfc_pad.at[0, h_pad - 1].set(
        params["b_fc"].astype(jnp.float32)[0])

    return {"wih": wih_pad, "bias": bias_pad, "whh": whh_pad, "wfc": wfc_pad}


def net_forward(x, prepped):
    """x: (B, T, 1) float32 -> (B,) float32 (matches Net.forward)."""
    B, T, I = x.shape
    assert I == 1
    HP = prepped["whh"].shape[0]

    x_tm = jnp.transpose(x, (1, 0, 2)).astype(jnp.float32)           # (T, B, 1)

    out = pl.pallas_call(
        _lstm_fc_kernel,
        out_shape=jax.ShapeDtypeStruct((B, 1), jnp.float32),
        grid_spec=pltpu.PrefetchScalarGridSpec(
            num_scalar_prefetch=0,
            grid=(1,),
            in_specs=[
                pl.BlockSpec((T, B, 1), lambda i: (0, 0, 0)),        # x
                pl.BlockSpec((1, 4 * HP), lambda i: (0, 0)),         # w_ih row
                pl.BlockSpec((1, 4 * HP), lambda i: (0, 0)),         # fused bias
                pl.BlockSpec((HP, 4 * HP), lambda i: (0, 0)),        # W_hh^T
                pl.BlockSpec((1, HP), lambda i: (0, 0)),             # fc weight (+bias lane)
            ],
            out_specs=pl.BlockSpec((B, 1), lambda i: (0, 0)),
            scratch_shapes=[],
        ),
        compiler_params=pltpu.CompilerParams(
            dimension_semantics=("arbitrary",)),
    )(x_tm, prepped["wih"], prepped["bias"], prepped["whh"], prepped["wfc"])

    return out[:, 0]   # .squeeze(-1)


def net_forward_ref(x, params):
    """Pure-JAX reference of the same forward pass, for verification."""
    B, T, I = x.shape
    H = params["w_hh"].shape[1]
    h = jnp.zeros((B, H), jnp.float32)
    c = jnp.zeros((B, H), jnp.float32)
    b = params["b_ih"] + params["b_hh"]
    for t in range(T):
        gates = x[:, t, :] @ params["w_ih"].T + h @ params["w_hh"].T + b
        i_g = jax.nn.sigmoid(gates[:, 0:H])
        f_g = jax.nn.sigmoid(gates[:, H:2 * H])
        g_g = jnp.tanh(gates[:, 2 * H:3 * H])
        o_g = jax.nn.sigmoid(gates[:, 3 * H:4 * H])
        c = f_g * c + i_g * g_g
        h = o_g * jnp.tanh(c)
    out = h @ params["w_fc"].T + params["b_fc"]
    return out[:, 0]


if __name__ == "__main__":
    key = jax.random.PRNGKey(0)
    k_param, k_x = jax.random.split(key)

    B, T = 2, 8
    params = init_params(k_param)
    prepped = prepare_params(params)          # one-time parameter prep
    x = jax.random.normal(k_x, (B, T, INPUT_SIZE), dtype=jnp.float32)

    out = net_forward(x, prepped)
    out = jax.block_until_ready(out)

    ref = net_forward_ref(x, params)
    assert out.shape == (B,), out.shape
    assert jnp.allclose(out, ref, atol=1e-5, rtol=1e-5), (out, ref)

    print("KERNEL_OK")
</pallas_src>

<mosaic_0001>
module attributes {stable_mosaic.version = 11 : i64} {
  func.func @_lstm_fc_kernel(%arg0: i32, %arg1: memref<8x2x1xf32, #tpu.memory_space<vmem>>, %arg2: memref<1x512xf32, #tpu.memory_space<vmem>>, %arg3: memref<1x512xf32, #tpu.memory_space<vmem>>, %arg4: memref<128x512xf32, #tpu.memory_space<vmem>>, %arg5: memref<1x128xf32, #tpu.memory_space<vmem>>, %arg6: memref<2x1xf32, #tpu.memory_space<vmem>>) attributes {dimension_semantics = [#tpu.dimension_semantics<arbitrary>], iteration_bounds = array<i64: 1>, scalar_prefetch = 0 : i64, scratch_operands = 0 : i64, tpu.core_type = #tpu.core_type<tc>, window_params = [{pipeline_mode = #tpu.pipeline_mode<synchronous>, transform_indices = @transform_0, window_bounds = array<i64: 8, 2, 1>}, {pipeline_mode = #tpu.pipeline_mode<synchronous>, transform_indices = @transform_1, window_bounds = array<i64: 1, 512>}, {pipeline_mode = #tpu.pipeline_mode<synchronous>, transform_indices = @transform_2, window_bounds = array<i64: 1, 512>}, {pipeline_mode = #tpu.pipeline_mode<synchronous>, transform_indices = @transform_3, window_bounds = array<i64: 128, 512>}, {pipeline_mode = #tpu.pipeline_mode<synchronous>, transform_indices = @transform_4, window_bounds = array<i64: 1, 128>}, {pipeline_mode = #tpu.pipeline_mode<synchronous>, transform_indices = @transform_5, window_bounds = array<i64: 2, 1>}]} {
    %c0 = arith.constant 0 : index
    %c0_0 = arith.constant 0 : index
    %0 = vector.load %arg2[%c0, %c0_0] : memref<1x512xf32, #tpu.memory_space<vmem>>, vector<1x512xf32>
    %c0_1 = arith.constant 0 : index
    %c0_2 = arith.constant 0 : index
    %1 = vector.load %arg3[%c0_1, %c0_2] : memref<1x512xf32, #tpu.memory_space<vmem>>, vector<1x512xf32>
    %c0_3 = arith.constant 0 : index
    %c0_4 = arith.constant 0 : index
    %2 = vector.load %arg4[%c0_3, %c0_4] : memref<128x512xf32, #tpu.memory_space<vmem>>, vector<128x512xf32>
    %c0_5 = arith.constant 0 : index
    %c0_6 = arith.constant 0 : index
    %3 = vector.load %arg5[%c0_5, %c0_6] : memref<1x128xf32, #tpu.memory_space<vmem>>, vector<1x128xf32>
    %4 = tpu.iota {dimensions = array<i32: 1>} : vector<1x512xi32>
    %c256_i32 = arith.constant 256 : i32
    %5 = vector.broadcast %c256_i32 : i32 to vector<1x512xi32>
    %6 = arith.cmpi sge, %4, %5 : vector<1x512xi32>
    %c384_i32 = arith.constant 384 : i32
    %7 = vector.broadcast %c384_i32 : i32 to vector<1x512xi32>
    %8 = arith.cmpi slt, %4, %7 : vector<1x512xi32>
    %9 = arith.andi %6, %8 : vector<1x512xi1>
    %cst = arith.constant 1.000000e+00 : f32
    %cst_7 = arith.constant 5.000000e-01 : f32
    %10 = vector.broadcast %cst : f32 to vector<1x512xf32>
    %11 = vector.broadcast %cst_7 : f32 to vector<1x512xf32>
    %12 = arith.select %9, %10, %11 : vector<1x512xi1>, vector<1x512xf32>
    %cst_8 = arith.constant 0.000000e+00 : f32
    %cst_9 = arith.constant 5.000000e-01 : f32
    %13 = vector.broadcast %cst_8 : f32 to vector<1x512xf32>
    %14 = vector.broadcast %cst_9 : f32 to vector<1x512xf32>
    %15 = arith.select %9, %13, %14 : vector<1x512xi1>, vector<1x512xf32>
    %cst_10 = arith.constant 0.000000e+00 : f32
    %16 = vector.broadcast %cst_10 : f32 to vector<2x128xf32>
    %cst_11 = arith.constant 0.000000e+00 : f32
    %17 = vector.broadcast %cst_11 : f32 to vector<2x128xf32>
    %c0_i32 = arith.constant 0 : i32
    %18 = arith.index_cast %c0_i32 : i32 to index
    %c0_12 = arith.constant 0 : index
    %c0_13 = arith.constant 0 : index
    %19 = vector.load %arg1[%18, %c0_12, %c0_13] : memref<8x2x1xf32, #tpu.memory_space<vmem>>, vector<1x2x1xf32>
    %20 = vector.shape_cast %19 : vector<1x2x1xf32> to vector<2x1xf32>
    %21 = vector.broadcast %20 : vector<2x1xf32> to vector<2x512xf32>
    %22 = vector.broadcast %0 : vector<1x512xf32> to vector<2x512xf32>
    %23 = arith.mulf %21, %22 : vector<2x512xf32>
    %24 = vector.broadcast %1 : vector<1x512xf32> to vector<2x512xf32>
    %25 = arith.addf %23, %24 : vector<2x512xf32>
    %cst_14 = arith.constant dense<0.000000e+00> : vector<2x512xf32>
    %26 = tpu.matmul %16, %2, %cst_14 {dimension_numbers = #tpu.dot_dimension_numbers<[1], [0], [0], [1], [0, 0, 1, 1], [], []>} : vector<2x128xf32>, vector<128x512xf32>, vector<2x512xf32> -> vector<2x512xf32>
    %27 = arith.addf %25, %26 : vector<2x512xf32>
    %28 = math.tanh %27 : vector<2x512xf32>
    %29 = vector.broadcast %12 : vector<1x512xf32> to vector<2x512xf32>
    %30 = arith.mulf %28, %29 : vector<2x512xf32>
    %31 = vector.broadcast %15 : vector<1x512xf32> to vector<2x512xf32>
    %32 = arith.addf %30, %31 : vector<2x512xf32>
    %33 = vector.extract_strided_slice %32 {offsets = [0, 0], sizes = [2, 128], strides = [1, 1]} : vector<2x512xf32> to vector<2x128xf32>
    %34 = vector.extract_strided_slice %32 {offsets = [0, 128], sizes = [2, 128], strides = [1, 1]} : vector<2x512xf32> to vector<2x128xf32>
    %35 = vector.extract_strided_slice %32 {offsets = [0, 256], sizes = [2, 128], strides = [1, 1]} : vector<2x512xf32> to vector<2x128xf32>
    %36 = vector.extract_strided_slice %32 {offsets = [0, 384], sizes = [2, 128], strides = [1, 1]} : vector<2x512xf32> to vector<2x128xf32>
    %37 = arith.mulf %34, %17 : vector<2x128xf32>
    %38 = arith.mulf %33, %35 : vector<2x128xf32>
    %39 = arith.addf %37, %38 : vector<2x128xf32>
    %40 = math.tanh %39 : vector<2x128xf32>
    %41 = arith.mulf %36, %40 : vector<2x128xf32>
    %c1_i32 = arith.constant 1 : i32
    %42 = arith.index_cast %c1_i32 : i32 to index
    %c0_15 = arith.constant 0 : index
    %c0_16 = arith.constant 0 : index
    %43 = vector.load %arg1[%42, %c0_15, %c0_16] : memref<8x2x1xf32, #tpu.memory_space<vmem>>, vector<1x2x1xf32>
    %44 = vector.shape_cast %43 : vector<1x2x1xf32> to vector<2x1xf32>
    %45 = vector.broadcast %44 : vector<2x1xf32> to vector<2x512xf32>
    %46 = vector.broadcast %0 : vector<1x512xf32> to vector<2x512xf32>
    %47 = arith.mulf %45, %46 : vector<2x512xf32>
    %48 = vector.broadcast %1 : vector<1x512xf32> to vector<2x512xf32>
    %49 = arith.addf %47, %48 : vector<2x512xf32>
    %cst_17 = arith.constant dense<0.000000e+00> : vector<2x512xf32>
    %50 = tpu.matmul %41, %2, %cst_17 {dimension_numbers = #tpu.dot_dimension_numbers<[1], [0], [0], [1], [0, 0, 1, 1], [], []>} : vector<2x128xf32>, vector<128x512xf32>, vector<2x512xf32> -> vector<2x512xf32>
    %51 = arith.addf %49, %50 : vector<2x512xf32>
    %52 = math.tanh %51 : vector<2x512xf32>
    %53 = vector.broadcast %12 : vector<1x512xf32> to vector<2x512xf32>
    %54 = arith.mulf %52, %53 : vector<2x512xf32>
    %55 = vector.broadcast %15 : vector<1x512xf32> to vector<2x512xf32>
    %56 = arith.addf %54, %55 : vector<2x512xf32>
    %57 = vector.extract_strided_slice %56 {offsets = [0, 0], sizes = [2, 128], strides = [1, 1]} : vector<2x512xf32> to vector<2x128xf32>
    %58 = vector.extract_strided_slice %56 {offsets = [0, 128], sizes = [2, 128], strides = [1, 1]} : vector<2x512xf32> to vector<2x128xf32>
    %59 = vector.extract_strided_slice %56 {offsets = [0, 256], sizes = [2, 128], strides = [1, 1]} : vector<2x512xf32> to vector<2x128xf32>
    %60 = vector.extract_strided_slice %56 {offsets = [0, 384], sizes = [2, 128], strides = [1, 1]} : vector<2x512xf32> to vector<2x128xf32>
    %61 = arith.mulf %58, %39 : vector<2x128xf32>
    %62 = arith.mulf %57, %59 : vector<2x128xf32>
    %63 = arith.addf %61, %62 : vector<2x128xf32>
    %64 = math.tanh %63 : vector<2x128xf32>
    %65 = arith.mulf %60, %64 : vector<2x128xf32>
    %c2_i32 = arith.constant 2 : i32
    %66 = arith.index_cast %c2_i32 : i32 to index
    %c0_18 = arith.constant 0 : index
    %c0_19 = arith.constant 0 : index
    %67 = vector.load %arg1[%66, %c0_18, %c0_19] : memref<8x2x1xf32, #tpu.memory_space<vmem>>, vector<1x2x1xf32>
    %68 = vector.shape_cast %67 : vector<1x2x1xf32> to vector<2x1xf32>
    %69 = vector.broadcast %68 : vector<2x1xf32> to vector<2x512xf32>
    %70 = vector.broadcast %0 : vector<1x512xf32> to vector<2x512xf32>
    %71 = arith.mulf %69, %70 : vector<2x512xf32>
    %72 = vector.broadcast %1 : vector<1x512xf32> to vector<2x512xf32>
    %73 = arith.addf %71, %72 : vector<2x512xf32>
    %cst_20 = arith.constant dense<0.000000e+00> : vector<2x512xf32>
    %74 = tpu.matmul %65, %2, %cst_20 {dimension_numbers = #tpu.dot_dimension_numbers<[1], [0], [0], [1], [0, 0, 1, 1], [], []>} : vector<2x128xf32>, vector<128x512xf32>, vector<2x512xf32> -> vector<2x512xf32>
    %75 = arith.addf %73, %74 : vector<2x512xf32>
    %76 = math.tanh %75 : vector<2x512xf32>
    %77 = vector.broadcast %12 : vector<1x512xf32> to vector<2x512xf32>
    %78 = arith.mulf %76, %77 : vector<2x512xf32>
    %79 = vector.broadcast %15 : vector<1x512xf32> to vector<2x512xf32>
    %80 = arith.addf %78, %79 : vector<2x512xf32>
    %81 = vector.extract_strided_slice %80 {offsets = [0, 0], sizes = [2, 128], strides = [1, 1]} : vector<2x512xf32> to vector<2x128xf32>
    %82 = vector.extract_strided_slice %80 {offsets = [0, 128], sizes = [2, 128], strides = [1, 1]} : vector<2x512xf32> to vector<2x128xf32>
    %83 = vector.extract_strided_slice %80 {offsets = [0, 256], sizes = [2, 128], strides = [1, 1]} : vector<2x512xf32> to vector<2x128xf32>
    %84 = vector.extract_strided_slice %80 {offsets = [0, 384], sizes = [2, 128], strides = [1, 1]} : vector<2x512xf32> to vector<2x128xf32>
    %85 = arith.mulf %82, %63 : vector<2x128xf32>
    %86 = arith.mulf %81, %83 : vector<2x128xf32>
    %87 = arith.addf %85, %86 : vector<2x128xf32>
    %88 = math.tanh %87 : vector<2x128xf32>
    %89 = arith.mulf %84, %88 : vector<2x128xf32>
    %c3_i32 = arith.constant 3 : i32
    %90 = arith.index_cast %c3_i32 : i32 to index
    %c0_21 = arith.constant 0 : index
    %c0_22 = arith.constant 0 : index
    %91 = vector.load %arg1[%90, %c0_21, %c0_22] : memref<8x2x1xf32, #tpu.memory_space<vmem>>, vector<1x2x1xf32>
    %92 = vector.shape_cast %91 : vector<1x2x1xf32> to vector<2x1xf32>
    %93 = vector.broadcast %92 : vector<2x1xf32> to vector<2x512xf32>
    %94 = vector.broadcast %0 : vector<1x512xf32> to vector<2x512xf32>
    %95 = arith.mulf %93, %94 : vector<2x512xf32>
    %96 = vector.broadcast %1 : vector<1x512xf32> to vector<2x512xf32>
    %97 = arith.addf %95, %96 : vector<2x512xf32>
    %cst_23 = arith.constant dense<0.000000e+00> : vector<2x512xf32>
    %98 = tpu.matmul %89, %2, %cst_23 {dimension_numbers = #tpu.dot_dimension_numbers<[1], [0], [0], [1], [0, 0, 1, 1], [], []>} : vector<2x128xf32>, vector<128x512xf32>, vector<2x512xf32> -> vector<2x512xf32>
    %99 = arith.addf %97, %98 : vector<2x512xf32>
    %100 = math.tanh %99 : vector<2x512xf32>
    %101 = vector.broadcast %12 : vector<1x512xf32> to vector<2x512xf32>
    %102 = arith.mulf %100, %101 : vector<2x512xf32>
    %103 = vector.broadcast %15 : vector<1x512xf32> to vector<2x512xf32>
    %104 = arith.addf %102, %103 : vector<2x512xf32>
    %105 = vector.extract_strided_slice %104 {offsets = [0, 0], sizes = [2, 128], strides = [1, 1]} : vector<2x512xf32> to vector<2x128xf32>
    %106 = vector.extract_strided_slice %104 {offsets = [0, 128], sizes = [2, 128], strides = [1, 1]} : vector<2x512xf32> to vector<2x128xf32>
    %107 = vector.extract_strided_slice %104 {offsets = [0, 256], sizes = [2, 128], strides = [1, 1]} : vector<2x512xf32> to vector<2x128xf32>
    %108 = vector.extract_strided_slice %104 {offsets = [0, 384], sizes = [2, 128], strides = [1, 1]} : vector<2x512xf32> to vector<2x128xf32>
    %109 = arith.mulf %106, %87 : vector<2x128xf32>
    %110 = arith.mulf %105, %107 : vector<2x128xf32>
    %111 = arith.addf %109, %110 : vector<2x128xf32>
    %112 = math.tanh %111 : vector<2x128xf32>
    %113 = arith.mulf %108, %112 : vector<2x128xf32>
    %c4_i32 = arith.constant 4 : i32
    %114 = arith.index_cast %c4_i32 : i32 to index
    %c0_24 = arith.constant 0 : index
    %c0_25 = arith.constant 0 : index
    %115 = vector.load %arg1[%114, %c0_24, %c0_25] : memref<8x2x1xf32, #tpu.memory_space<vmem>>, vector<1x2x1xf32>
    %116 = vector.shape_cast %115 : vector<1x2x1xf32> to vector<2x1xf32>
    %117 = vector.broadcast %116 : vector<2x1xf32> to vector<2x512xf32>
    %118 = vector.broadcast %0 : vector<1x512xf32> to vector<2x512xf32>
    %119 = arith.mulf %117, %118 : vector<2x512xf32>
    %120 = vector.broadcast %1 : vector<1x512xf32> to vector<2x512xf32>
    %121 = arith.addf %119, %120 : vector<2x512xf32>
    %cst_26 = arith.constant dense<0.000000e+00> : vector<2x512xf32>
    %122 = tpu.matmul %113, %2, %cst_26 {dimension_numbers = #tpu.dot_dimension_numbers<[1], [0], [0], [1], [0, 0, 1, 1], [], []>} : vector<2x128xf32>, vector<128x512xf32>, vector<2x512xf32> -> vector<2x512xf32>
    %123 = arith.addf %121, %122 : vector<2x512xf32>
    %124 = math.tanh %123 : vector<2x512xf32>
    %125 = vector.broadcast %12 : vector<1x512xf32> to vector<2x512xf32>
    %126 = arith.mulf %124, %125 : vector<2x512xf32>
    %127 = vector.broadcast %15 : vector<1x512xf32> to vector<2x512xf32>
    %128 = arith.addf %126, %127 : vector<2x512xf32>
    %129 = vector.extract_strided_slice %128 {offsets = [0, 0], sizes = [2, 128], strides = [1, 1]} : vector<2x512xf32> to vector<2x128xf32>
    %130 = vector.extract_strided_slice %128 {offsets = [0, 128], sizes = [2, 128], strides = [1, 1]} : vector<2x512xf32> to vector<2x128xf32>
    %131 = vector.extract_strided_slice %128 {offsets = [0, 256], sizes = [2, 128], strides = [1, 1]} : vector<2x512xf32> to vector<2x128xf32>
    %132 = vector.extract_strided_slice %128 {offsets = [0, 384], sizes = [2, 128], strides = [1, 1]} : vector<2x512xf32> to vector<2x128xf32>
    %133 = arith.mulf %130, %111 : vector<2x128xf32>
    %134 = arith.mulf %129, %131 : vector<2x128xf32>
    %135 = arith.addf %133, %134 : vector<2x128xf32>
    %136 = math.tanh %135 : vector<2x128xf32>
    %137 = arith.mulf %132, %136 : vector<2x128xf32>
    %c5_i32 = arith.constant 5 : i32
    %138 = arith.index_cast %c5_i32 : i32 to index
    %c0_27 = arith.constant 0 : index
    %c0_28 = arith.constant 0 : index
    %139 = vector.load %arg1[%138, %c0_27, %c0_28] : memref<8x2x1xf32, #tpu.memory_space<vmem>>, vector<1x2x1xf32>
    %140 = vector.shape_cast %139 : vector<1x2x1xf32> to vector<2x1xf32>
    %141 = vector.broadcast %140 : vector<2x1xf32> to vector<2x512xf32>
    %142 = vector.broadcast %0 : vector<1x512xf32> to vector<2x512xf32>
    %143 = arith.mulf %141, %142 : vector<2x512xf32>
    %144 = vector.broadcast %1 : vector<1x512xf32> to vector<2x512xf32>
    %145 = arith.addf %143, %144 : vector<2x512xf32>
    %cst_29 = arith.constant dense<0.000000e+00> : vector<2x512xf32>
    %146 = tpu.matmul %137, %2, %cst_29 {dimension_numbers = #tpu.dot_dimension_numbers<[1], [0], [0], [1], [0, 0, 1, 1], [], []>} : vector<2x128xf32>, vector<128x512xf32>, vector<2x512xf32> -> vector<2x512xf32>
    %147 = arith.addf %145, %146 : vector<2x512xf32>
    %148 = math.tanh %147 : vector<2x512xf32>
    %149 = vector.broadcast %12 : vector<1x512xf32> to vector<2x512xf32>
    %150 = arith.mulf %148, %149 : vector<2x512xf32>
    %151 = vector.broadcast %15 : vector<1x512xf32> to vector<2x512xf32>
    %152 = arith.addf %150, %151 : vector<2x512xf32>
    %153 = vector.extract_strided_slice %152 {offsets = [0, 0], sizes = [2, 128], strides = [1, 1]} : vector<2x512xf32> to vector<2x128xf32>
    %154 = vector.extract_strided_slice %152 {offsets = [0, 128], sizes = [2, 128], strides = [1, 1]} : vector<2x512xf32> to vector<2x128xf32>
    %155 = vector.extract_strided_slice %152 {offsets = [0, 256], sizes = [2, 128], strides = [1, 1]} : vector<2x512xf32> to vector<2x128xf32>
    %156 = vector.extract_strided_slice %152 {offsets = [0, 384], sizes = [2, 128], strides = [1, 1]} : vector<2x512xf32> to vector<2x128xf32>
    %157 = arith.mulf %154, %135 : vector<2x128xf32>
    %158 = arith.mulf %153, %155 : vector<2x128xf32>
    %159 = arith.addf %157, %158 : vector<2x128xf32>
    %160 = math.tanh %159 : vector<2x128xf32>
    %161 = arith.mulf %156, %160 : vector<2x128xf32>
    %c6_i32 = arith.constant 6 : i32
    %162 = arith.index_cast %c6_i32 : i32 to index
    %c0_30 = arith.constant 0 : index
    %c0_31 = arith.constant 0 : index
    %163 = vector.load %arg1[%162, %c0_30, %c0_31] : memref<8x2x1xf32, #tpu.memory_space<vmem>>, vector<1x2x1xf32>
    %164 = vector.shape_cast %163 : vector<1x2x1xf32> to vector<2x1xf32>
    %165 = vector.broadcast %164 : vector<2x1xf32> to vector<2x512xf32>
    %166 = vector.broadcast %0 : vector<1x512xf32> to vector<2x512xf32>
    %167 = arith.mulf %165, %166 : vector<2x512xf32>
    %168 = vector.broadcast %1 : vector<1x512xf32> to vector<2x512xf32>
    %169 = arith.addf %167, %168 : vector<2x512xf32>
    %cst_32 = arith.constant dense<0.000000e+00> : vector<2x512xf32>
    %170 = tpu.matmul %161, %2, %cst_32 {dimension_numbers = #tpu.dot_dimension_numbers<[1], [0], [0], [1], [0, 0, 1, 1], [], []>} : vector<2x128xf32>, vector<128x512xf32>, vector<2x512xf32> -> vector<2x512xf32>
    %171 = arith.addf %169, %170 : vector<2x512xf32>
    %172 = math.tanh %171 : vector<2x512xf32>
    %173 = vector.broadcast %12 : vector<1x512xf32> to vector<2x512xf32>
    %174 = arith.mulf %172, %173 : vector<2x512xf32>
    %175 = vector.broadcast %15 : vector<1x512xf32> to vector<2x512xf32>
    %176 = arith.addf %174, %175 : vector<2x512xf32>
    %177 = vector.extract_strided_slice %176 {offsets = [0, 0], sizes = [2, 128], strides = [1, 1]} : vector<2x512xf32> to vector<2x128xf32>
    %178 = vector.extract_strided_slice %176 {offsets = [0, 128], sizes = [2, 128], strides = [1, 1]} : vector<2x512xf32> to vector<2x128xf32>
    %179 = vector.extract_strided_slice %176 {offsets = [0, 256], sizes = [2, 128], strides = [1, 1]} : vector<2x512xf32> to vector<2x128xf32>
    %180 = vector.extract_strided_slice %176 {offsets = [0, 384], sizes = [2, 128], strides = [1, 1]} : vector<2x512xf32> to vector<2x128xf32>
    %181 = arith.mulf %178, %159 : vector<2x128xf32>
    %182 = arith.mulf %177, %179 : vector<2x128xf32>
    %183 = arith.addf %181, %182 : vector<2x128xf32>
    %184 = math.tanh %183 : vector<2x128xf32>
    %185 = arith.mulf %180, %184 : vector<2x128xf32>
    %c7_i32 = arith.constant 7 : i32
    %186 = arith.index_cast %c7_i32 : i32 to index
    %c0_33 = arith.constant 0 : index
    %c0_34 = arith.constant 0 : index
    %187 = vector.load %arg1[%186, %c0_33, %c0_34] : memref<8x2x1xf32, #tpu.memory_space<vmem>>, vector<1x2x1xf32>
    %188 = vector.shape_cast %187 : vector<1x2x1xf32> to vector<2x1xf32>
    %189 = vector.broadcast %188 : vector<2x1xf32> to vector<2x512xf32>
    %190 = vector.broadcast %0 : vector<1x512xf32> to vector<2x512xf32>
    %191 = arith.mulf %189, %190 : vector<2x512xf32>
    %192 = vector.broadcast %1 : vector<1x512xf32> to vector<2x512xf32>
    %193 = arith.addf %191, %192 : vector<2x512xf32>
    %cst_35 = arith.constant dense<0.000000e+00> : vector<2x512xf32>
    %194 = tpu.matmul %185, %2, %cst_35 {dimension_numbers = #tpu.dot_dimension_numbers<[1], [0], [0], [1], [0, 0, 1, 1], [], []>} : vector<2x128xf32>, vector<128x512xf32>, vector<2x512xf32> -> vector<2x512xf32>
    %195 = arith.addf %193, %194 : vector<2x512xf32>
    %196 = math.tanh %195 : vector<2x512xf32>
    %197 = vector.broadcast %12 : vector<1x512xf32> to vector<2x512xf32>
    %198 = arith.mulf %196, %197 : vector<2x512xf32>
    %199 = vector.broadcast %15 : vector<1x512xf32> to vector<2x512xf32>
    %200 = arith.addf %198, %199 : vector<2x512xf32>
    %201 = vector.extract_strided_slice %200 {offsets = [0, 0], sizes = [2, 128], strides = [1, 1]} : vector<2x512xf32> to vector<2x128xf32>
    %202 = vector.extract_strided_slice %200 {offsets = [0, 128], sizes = [2, 128], strides = [1, 1]} : vector<2x512xf32> to vector<2x128xf32>
    %203 = vector.extract_strided_slice %200 {offsets = [0, 256], sizes = [2, 128], strides = [1, 1]} : vector<2x512xf32> to vector<2x128xf32>
    %204 = vector.extract_strided_slice %200 {offsets = [0, 384], sizes = [2, 128], strides = [1, 1]} : vector<2x512xf32> to vector<2x128xf32>
    %205 = arith.mulf %202, %183 : vector<2x128xf32>
    %206 = arith.mulf %201, %203 : vector<2x128xf32>
    %207 = arith.addf %205, %206 : vector<2x128xf32>
    %208 = math.tanh %207 : vector<2x128xf32>
    %209 = arith.mulf %204, %208 : vector<2x128xf32>
    %c8_i32 = arith.constant 8 : i32
    %210 = vector.extract_strided_slice %3 {offsets = [0, 127], sizes = [1, 1], strides = [1, 1]} : vector<1x128xf32> to vector<1x1xf32>
    %211 = vector.broadcast %3 : vector<1x128xf32> to vector<2x128xf32>
    %212 = arith.mulf %209, %211 : vector<2x128xf32>
    %cst_36 = arith.constant dense<0.000000e+00> : vector<2xf32>
    %213 = vector.multi_reduction <add>, %212, %cst_36 [1] : vector<2x128xf32> to vector<2xf32>
    %214 = vector.shape_cast %213 : vector<2xf32> to vector<2x1xf32>
    %215 = vector.broadcast %210 : vector<1x1xf32> to vector<2x1xf32>
    %216 = arith.addf %214, %215 : vector<2x1xf32>
    %c0_37 = arith.constant 0 : index
    %c0_38 = arith.constant 0 : index
    %217 = vector.load %arg6[%c0_37, %c0_38] : memref<2x1xf32, #tpu.memory_space<vmem>>, vector<2x1xf32>
    tpu.vector_store %arg6[%c0_37, %c0_38], %216 {strides = array<i32>} : memref<2x1xf32, #tpu.memory_space<vmem>>, vector<2x1xf32>,
    return
  }
  func.func @transform_0(%arg0: i32) -> (i32, i32, i32) {
    %c0_i32 = arith.constant 0 : i32
    %c0_i32_0 = arith.constant 0 : i32
    %c0_i32_1 = arith.constant 0 : i32
    %c0_i32_2 = arith.constant 0 : i32
    return %c0_i32, %c0_i32_0, %c0_i32_1 : i32, i32, i32
  }
  func.func @transform_1(%arg0: i32) -> (i32, i32) {
    %c0_i32 = arith.constant 0 : i32
    %c0_i32_0 = arith.constant 0 : i32
    %c0_i32_1 = arith.constant 0 : i32
    return %c0_i32, %c0_i32_0 : i32, i32
  }
  func.func @transform_2(%arg0: i32) -> (i32, i32) {
    %c0_i32 = arith.constant 0 : i32
    %c0_i32_0 = arith.constant 0 : i32
    %c0_i32_1 = arith.constant 0 : i32
    return %c0_i32, %c0_i32_0 : i32, i32
  }
  func.func @transform_3(%arg0: i32) -> (i32, i32) {
    %c0_i32 = arith.constant 0 : i32
    %c0_i32_0 = arith.constant 0 : i32
    %c0_i32_1 = arith.constant 0 : i32
    return %c0_i32, %c0_i32_0 : i32, i32
  }
  func.func @transform_4(%arg0: i32) -> (i32, i32) {
    %c0_i32 = arith.constant 0 : i32
    %c0_i32_0 = arith.constant 0 : i32
    %c0_i32_1 = arith.constant 0 : i32
    return %c0_i32, %c0_i32_0 : i32, i32
  }
  func.func @transform_5(%arg0: i32) -> (i32, i32) {
    %c0_i32 = arith.constant 0 : i32
    %c0_i32_0 = arith.constant 0 : i32
    %c0_i32_1 = arith.constant 0 : i32
    return %c0_i32, %c0_i32_0 : i32, i32
  }
}

</mosaic_0001>

<bundles_post_ra>
// kernel: tpu_custom_call.1
= control target key start
LH: loop header
LB: loop body
LE: loop exit
PB: predicated region body
PF: predicated region fallthrough
CT: control target
= control target key end

     0   :  { %10 = vsyncpa [#allocation3], 0  ;;  %s1280_s21 = smov [#allocation2]   ;;  %s1281_s23 = smov 512   ;;  %s2223_s0 = inlined_call_operand.vmem [shape: f32[8,2,1], index: 0, kind: input, shape index: {}]   ;;  %s2224_s1 = inlined_call_operand.vmem [shape: f32[1,512], index: 1, kind: input, shape index: {}]   ;;  %s2225_s2 = inlined_call_operand.vmem [shape: f32[1,512], index: 2, kind: input, shape index: {}]   ;;  %s2226_s3 = inlined_call_operand.hbm [shape: f32[128,512], index: 3, kind: input, shape index: {}]   ;;  %s2227_s4 = inlined_call_operand.vmem [shape: f32[1,128], index: 4, kind: input, shape index: {}]   ;;  %s2228_s5 = inlined_call_operand.vmem [shape: f32[2,1], index: 5, kind: output, shape index: {}]  }
   0x1   :  { %s21_s20 = sshll.u32 %s2226_s3, 4  ;;  %s23_s22 = sshll.u32 %s1280_s21, 4  ;;  %s22_s20 = int_to_ptr.hbm [resolvable:$true] %s21_s20  ;;  %s24_s22 = int_to_ptr.vmem [resolvable:$true] %s23_s22 }
   0x2   :  { %s1282_s24 = smov 32  }
   0x3   :  { %29 = dma.hbm_to_vmem [thread:$0]  %s22_s20, 8192, %s24_s22, [#allocation3], %s1281_s23, %s1281_s23, %s1282_s24  }
   0x4   :  { %1278 = dma.done.wait [#allocation3], 8192  }
   0x5   :  { %1279 = vsyncadd [#allocation3], 4294959104  ;;  %v1283_v0 = vmov 0   ;;  %v1319_v1 = vld [vmem:[#allocation2 + $0x1f0] sm:$0xff]  ;;  %v1321_v2 = vld [vmem:[#allocation2 + $0x1f8] sm:$0xff]  ;;  %vm1077_vm0 = vcmask 1041408  }
   0x6   :  { %1106 = vset.pattern.permute.xlu0 %v1283_v0  ;;  %1107 = vset.pattern.permute.xlu1 %v1283_v0  ;;  %v1323_v3 = vld [vmem:[#allocation2 + $0x1e0] sm:$0xff]  ;;  %v1327_v4 = vld [vmem:[#allocation2 + $0x1e8] sm:$0xff]  ;;  %v1329_v5 = vld [vmem:[#allocation2 + $0x1d0] sm:$0xff]  ;;  %s1285_s18 = smov 1   ;;  %vm1086_vm1 = vcmask 1024  }
   0x7   :  { %1108 = vset.pattern.permute.xlu2 %v1283_v0  ;;  %200 = vmatpush.msra.mxu2 %v1319_v1  ;;  %v1331_v6 = vld [vmem:[#allocation2 + $0x1d8] sm:$0xff]  ;;  %v1335_v7 = vld [vmem:[#allocation2 + $0x1c0] sm:$0xff]  ;;  %v1337_v8 = vld [vmem:[#allocation2 + $0x1c8] sm:$0xff] }
   0x8   :  { %220 = vmatpush.msra.mxu3 %v1321_v2  ;;  %160 = vmatpush.msra.mxu0 %v1323_v3  ;;  %v1339_v9 = vld [vmem:[#allocation2 + $0x1b0] sm:$0xff]  ;;  %v1343_v10 = vld [vmem:[#allocation2 + $0x1b8] sm:$0xff]  ;;  %v1345_v11 = vld [vmem:[#allocation2 + $0x1a0] sm:$0xff] }
   0x9   :  { %180 = vmatpush.msra.mxu1 %v1327_v4  ;;  %201 = vmatpush.msra.mxu2 %v1329_v5  ;;  %v1347_v12 = vld [vmem:[#allocation2 + $0x1a8] sm:$0xff]  ;;  %v1351_v13 = vld [vmem:[#allocation2 + $0x190] sm:$0xff]  ;;  %v1353_v14 = vld [vmem:[#allocation2 + $0x198] sm:$0xff] }
   0xa   :  { %221 = vmatpush.msra.mxu3 %v1331_v6  ;;  %161 = vmatpush.msra.mxu0 %v1335_v7  ;;  %v1357_v15 = vld [vmem:[#allocation2 + $0x180] sm:$0xff]  ;;  %v1359_v16 = vld [vmem:[#allocation2 + $0x188] sm:$0xff]  ;;  %v1363_v17 = vld [vmem:[#allocation2 + $0x170] sm:$0xff] }
   0xb   :  { %181 = vmatpush.msra.mxu1 %v1337_v8  ;;  %202 = vmatpush.msra.mxu2 %v1339_v9  ;;  %v1365_v18 = vld [vmem:[#allocation2 + $0x178] sm:$0xff]  ;;  %v1369_v19 = vld [vmem:[#allocation2 + $0x160] sm:$0xff]  ;;  %v1371_v20 = vld [vmem:[#allocation2 + $0x168] sm:$0xff] }
   0xc   :  { %222 = vmatpush.msra.mxu3 %v1343_v10  ;;  %162 = vmatpush.msra.mxu0 %v1345_v11  ;;  %v1375_v21 = vld [vmem:[#allocation2 + $0x150] sm:$0xff]  ;;  %v1377_v22 = vld [vmem:[#allocation2 + $0x158] sm:$0xff]  ;;  %v1381_v23 = vld [vmem:[#allocation2 + $0x140] sm:$0xff] }
   0xd   :  { %182 = vmatpush.msra.mxu1 %v1347_v12  ;;  %203 = vmatpush.msra.mxu2 %v1351_v13  ;;  %v1383_v24 = vld [vmem:[#allocation2 + $0x148] sm:$0xff]  ;;  %v1387_v25 = vld [vmem:[#allocation2 + $0x130] sm:$0xff]  ;;  %v1389_v26 = vld [vmem:[#allocation2 + $0x138] sm:$0xff] }
   0xe   :  { %223 = vmatpush.msra.mxu3 %v1353_v14  ;;  %163 = vmatpush.msra.mxu0 %v1357_v15  ;;  %v1393_v27 = vld [vmem:[#allocation2 + $0x120] sm:$0xff]  ;;  %v1395_v28 = vld [vmem:[#allocation2 + $0x128] sm:$0xff]  ;;  %v1399_v29 = vld [vmem:[#allocation2 + $0x110] sm:$0xff] }
   0xf   :  { %183 = vmatpush.msra.mxu1 %v1359_v16  ;;  %204 = vmatpush.msra.mxu2 %v1363_v17  ;;  %v1401_v30 = vld [vmem:[#allocation2 + $0x118] sm:$0xff]  ;;  %v1405_v31 = vld [vmem:[#allocation2 + $0x100] sm:$0xff]  ;;  %v1407_v32 = vld [vmem:[#allocation2 + $0x108] sm:$0xff] }
  0x10   :  { %224 = vmatpush.msra.mxu3 %v1365_v18  ;;  %164 = vmatpush.msra.mxu0 %v1369_v19  ;;  %v1411_v33 = vld [vmem:[#allocation2 + $0xf0] sm:$0xff]  ;;  %v1413_v34 = vld [vmem:[#allocation2 + $0xf8] sm:$0xff]  ;;  %v1417_v35 = vld [vmem:[#allocation2 + $0xe0] sm:$0xff] }
  0x11   :  { %184 = vmatpush.msra.mxu1 %v1371_v20  ;;  %205 = vmatpush.msra.mxu2 %v1375_v21  ;;  %v1419_v36 = vld [vmem:[#allocation2 + $0xe8] sm:$0xff]  ;;  %v1423_v37 = vld [vmem:[#allocation2 + $0xd0] sm:$0xff]  ;;  %v1425_v38 = vld [vmem:[#allocation2 + $0xd8] sm:$0xff] }
  0x12   :  { %225 = vmatpush.msra.mxu3 %v1377_v22  ;;  %165 = vmatpush.msra.mxu0 %v1381_v23  ;;  %v1429_v39 = vld [vmem:[#allocation2 + $0xc0] sm:$0xff]  ;;  %v1431_v40 = vld [vmem:[#allocation2 + $0xc8] sm:$0xff]  ;;  %v1435_v41 = vld [vmem:[#allocation2 + $0xb0] sm:$0xff] }
  0x13   :  { %185 = vmatpush.msra.mxu1 %v1383_v24  ;;  %206 = vmatpush.msra.mxu2 %v1387_v25  ;;  %2335 = vst [vmem:[#allocation5_spill] sm:$0xff] %v1435_v41  ;;  %v1437_v42 = vld [vmem:[#allocation2 + $0xb8] sm:$0xff]  ;;  %v1441_v43 = vld [vmem:[#allocation2 + $0xa0] sm:$0xff]  ;;  %v1443_v44 = vld [vmem:[#allocation2 + $0xa8] sm:$0xff] }
  0x14   :  { %226 = vmatpush.msra.mxu3 %v1389_v26  ;;  %166 = vmatpush.msra.mxu0 %v1393_v27  ;;  %2336 = vst [vmem:[#allocation6_spill] sm:$0xff] %v1437_v42  ;;  %v1447_v45 = vld [vmem:[#allocation2 + $0x90] sm:$0xff]  ;;  %v1449_v46 = vld [vmem:[#allocation2 + $0x98] sm:$0xff]  ;;  %v128_v47 = vld [vmem:[%s2223_s0] sm:$0x3] }
  0x15   :  { %186 = vmatpush.msra.mxu1 %v1395_v28  ;;  %207 = vmatpush.msra.mxu2 %v1399_v29  ;;  %2337 = vst [vmem:[#allocation7_spill] sm:$0xff] %v1447_v45  ;;  %v1456_v48 = vld [vmem:[#allocation2 + $0x80] sm:$0xff]  ;;  %v1460_v49 = vld [vmem:[#allocation2 + $0x88] sm:$0xff]  ;;  %v1462_v50 = vld [vmem:[#allocation2 + $0x70] sm:$0xff] }
  0x16   :  { %227 = vmatpush.msra.mxu3 %v1401_v30  ;;  %167 = vmatpush.msra.mxu0 %v1405_v31  ;;  %2338 = vst [vmem:[#allocation8_spill] sm:$0xff] %v1449_v46  ;;  %v1466_v51 = vld [vmem:[#allocation2 + $0x78] sm:$0xff]  ;;  %v1468_v52 = vld [vmem:[#allocation2 + $0x60] sm:$0xff]  ;;  %v1471_v53 = vld [vmem:[#allocation2 + $0x68] sm:$0xff] }
  0x17   :  { %187 = vmatpush.msra.mxu1 %v1407_v32  ;;  %208 = vmatpush.msra.mxu2 %v1411_v33  ;;  %2339 = vst [vmem:[#allocation9_spill] sm:$0xff] %v1456_v48  ;;  %v1473_v54 = vld [vmem:[#allocation2 + $0x50] sm:$0xff]  ;;  %v1477_v55 = vld [vmem:[#allocation2 + $0x58] sm:$0xff]  ;;  %v1479_v56 = vld [vmem:[#allocation2 + $0x40] sm:$0xff] }
  0x18   :  { %228 = vmatpush.msra.mxu3 %v1413_v34  ;;  %168 = vmatpush.msra.mxu0 %v1417_v35  ;;  %2340 = vst [vmem:[#allocation10_spill] sm:$0xff] %v1460_v49  ;;  %v1483_v57 = vld [vmem:[#allocation2 + $0x48] sm:$0xff]  ;;  %v1485_v58 = vld [vmem:[#allocation2 + $0x30] sm:$0xff]  ;;  %v1489_v59 = vld [vmem:[#allocation2 + $0x38] sm:$0xff] }
  0x19   :  { %188 = vmatpush.msra.mxu1 %v1419_v36  ;;  %209 = vmatpush.msra.mxu2 %v1423_v37  ;;  %2341 = vst [vmem:[#allocation11_spill] sm:$0xff] %v1462_v50  ;;  %v1491_v60 = vld [vmem:[#allocation2 + $0x20] sm:$0xff]  ;;  %v1495_v61 = vld [vmem:[#allocation2 + $0x28] sm:$0xff]  ;;  %v1497_v62 = vld [vmem:[#allocation2 + $0x10] sm:$0xff] }
  0x1a   :  { %229 = vmatpush.msra.mxu3 %v1425_v38  ;;  %169 = vmatpush.msra.mxu0 %v1429_v39  ;;  %2342 = vst [vmem:[#allocation12_spill] sm:$0xff] %v1466_v51  ;;  %v1501_v63 = vld [vmem:[#allocation2 + $0x18] sm:$0xff]  ;;  %v1093_v0 = vld [vmem:[%s2223_s0 + $0x2] sm:$0x3] }
  0x1b   :  { %189 = vmatpush.msra.mxu1 %v1431_v40  ;;  %210 = vmatpush.msra.mxu2 %v1435_v41  ;;  %2343 = vst [vmem:[#allocation13_spill] sm:$0xff] %v1468_v52 }
  0x1c   :  { %230 = vmatpush.msra.mxu3 %v1437_v42  ;;  %170 = vmatpush.msra.mxu0 %v1441_v43  ;;  %2344 = vst [vmem:[#allocation14_spill] sm:$0xff] %v1471_v53 }
  0x1d   :  { %190 = vmatpush.msra.mxu1 %v1443_v44  ;;  %211 = vmatpush.msra.mxu2 %v1447_v45  ;;  %2345 = vst [vmem:[#allocation15_spill] sm:$0xff] %v1473_v54 }
  0x1e   :  { %231 = vmatpush.msra.mxu3 %v1449_v46  ;;  %131 = vperm.xlu0 %1106, %v128_v47   ;;  %2346 = vst [vmem:[#allocation16_spill] sm:$0xff] %v1477_v55  ;;  %v1510_v47 = vld [vmem:[#allocation2] sm:$0xff] }
  0x1f   :  { %171 = vmatpush.msra.mxu0 %v1456_v48  ;;  %191 = vmatpush.msra.mxu1 %v1460_v49  ;;  %2347 = vst [vmem:[#allocation17_spill] sm:$0xff] %v1479_v56 }
  0x20   :  { %212 = vmatpush.msra.mxu2 %v1462_v50  ;;  %232 = vmatpush.msra.mxu3 %v1466_v51  ;;  %2348 = vst [vmem:[#allocation18_spill] sm:$0xff] %v1483_v57 }
  0x21   :  { %172 = vmatpush.msra.mxu0 %v1468_v52  ;;  %2349 = vst [vmem:[#allocation19_spill] sm:$0xff] %v1485_v58  ;;  %192 = vmatpush.msra.mxu1 %v1471_v53 }
  0x22   :  { %213 = vmatpush.msra.mxu2 %v1473_v54  ;;  %2350 = vst [vmem:[#allocation20_spill] sm:$0xff] %v1489_v59  ;;  %233 = vmatpush.msra.mxu3 %v1477_v55  ;;  %v1512_v55 = vld [vmem:[#allocation2 + $0x8] sm:$0xff] }
  0x23   :  { %2351 = vst [vmem:[#allocation21_spill] sm:$0xff] %v1491_v60  ;;  %173 = vmatpush.msra.mxu0 %v1479_v56  ;;  %193 = vmatpush.msra.mxu1 %v1483_v57 }
  0x24   :  { %2352 = vst [vmem:[#allocation22_spill] sm:$0xff] %v1495_v61  ;;  %214 = vmatpush.msra.mxu2 %v1485_v58  ;;  %234 = vmatpush.msra.mxu3 %v1489_v59  ;;  %v1284_v58 = vmov 0.0  }
  0x25   :  { %2353 = vst [vmem:[#allocation23_spill] sm:$0xff] %v1497_v62  ;;  %174 = vmatpush.msra.mxu0 %v1491_v60  ;;  %194 = vmatpush.msra.mxu1 %v1495_v61 }
  0x26   :  { %2354 = vst [vmem:[#allocation24_spill] sm:$0xff] %v1501_v63  ;;  %215 = vmatpush.msra.mxu2 %v1497_v62  ;;  %235 = vmatpush.msra.mxu3 %v1501_v63  ;;  %v1098_v63 = vld [vmem:[%s2223_s0 + $0xc] sm:$0x3] }
  0x27   :  { %2355 = vst [vmem:[#allocation25_spill] sm:$0xff] %v1510_v47  ;;  %216 = vmatmul.f32.vlgmr.msra.gmra.mxu2 %v1284_v58  ;;  %236 = vmatmul.f32.vlgmr.msra.gmra.mxu3 %v1284_v58 }
  0x28   :  { %2356 = vst [vmem:[#allocation26_spill] sm:$0xff] %v1512_v55  ;;  %265 = vperm.xlu0 %1106, %v1093_v0   ;;  %175 = vmatpush.msra.mxu0 %v1510_v47 }
  0x29   :  { %195 = vmatpush.msra.mxu1 %v1512_v55  ;;  %176 = vmatmul.f32.vlgmr.msra.gmra.mxu0 %v1284_v58 }
  0x2a   :  { %196 = vmatmul.f32.vlgmr.msra.gmra.mxu1 %v1284_v58  ;;  %276 = vmatpush.msrb.mxu0 %v1323_v3  ;;  %v2357_v58 = vld [vmem:[#allocation16_spill] sm:$0xff] }
  0x2b   :  { %296 = vmatpush.msrb.mxu1 %v1327_v4  ;;  %316 = vmatpush.msrb.mxu2 %v1319_v1 }
  0x2c   :  { %336 = vmatpush.msrb.mxu3 %v1321_v2  ;;  %277 = vmatpush.msrb.mxu0 %v1335_v7 }
  0x2d   :  { %297 = vmatpush.msrb.mxu1 %v1337_v8  ;;  %317 = vmatpush.msrb.mxu2 %v1329_v5  ;;  %v2359_v0 = vld [vmem:[#allocation24_spill] sm:$0xff] }
  0x2e   :  { %337 = vmatpush.msrb.mxu3 %v1331_v6  ;;  %278 = vmatpush.msrb.mxu0 %v1345_v11 }
  0x2f   :  { %298 = vmatpush.msrb.mxu1 %v1347_v12  ;;  %318 = vmatpush.msrb.mxu2 %v1339_v9 }
  0x30   :  { %845 = vperm.xlu0 %1106, %v1098_v63   ;;  %338 = vmatpush.msrb.mxu3 %v1343_v10  ;;  %v2358_v63 = vld [vmem:[#allocation19_spill] sm:$0xff] }
  0x31   :  { %279 = vmatpush.msrb.mxu0 %v1357_v15  ;;  %299 = vmatpush.msrb.mxu1 %v1359_v16 }
  0x32   :  { %319 = vmatpush.msrb.mxu2 %v1351_v13  ;;  %339 = vmatpush.msrb.mxu3 %v1353_v14 }
  0x33   :  { %280 = vmatpush.msrb.mxu0 %v1369_v19  ;;  %300 = vmatpush.msrb.mxu1 %v1371_v20 }
  0x34   :  { %320 = vmatpush.msrb.mxu2 %v1363_v17  ;;  %340 = vmatpush.msrb.mxu3 %v1365_v18 }
  0x35   :  { %281 = vmatpush.msrb.mxu0 %v1381_v23  ;;  %301 = vmatpush.msrb.mxu1 %v1383_v24 }
  0x36   :  { %321 = vmatpush.msrb.mxu2 %v1375_v21  ;;  %341 = vmatpush.msrb.mxu3 %v1377_v22 }
  0x37   :  { %282 = vmatpush.msrb.mxu0 %v1393_v27  ;;  %302 = vmatpush.msrb.mxu1 %v1395_v28 }
  0x38   :  { %322 = vmatpush.msrb.mxu2 %v1387_v25  ;;  %342 = vmatpush.msrb.mxu3 %v1389_v26 }
  0x39   :  { %283 = vmatpush.msrb.mxu0 %v1405_v31  ;;  %303 = vmatpush.msrb.mxu1 %v1407_v32 }
  0x3a   :  { %323 = vmatpush.msrb.mxu2 %v1399_v29  ;;  %343 = vmatpush.msrb.mxu3 %v1401_v30 }
  0x3b   :  { %284 = vmatpush.msrb.mxu0 %v1417_v35  ;;  %304 = vmatpush.msrb.mxu1 %v1419_v36 }
  0x3c   :  { %324 = vmatpush.msrb.mxu2 %v1411_v33  ;;  %344 = vmatpush.msrb.mxu3 %v1413_v34 }
  0x3d   :  { %285 = vmatpush.msrb.mxu0 %v1429_v39  ;;  %305 = vmatpush.msrb.mxu1 %v1431_v40 }
  0x3e   :  { %325 = vmatpush.msrb.mxu2 %v1423_v37  ;;  %345 = vmatpush.msrb.mxu3 %v1425_v38 }
  0x3f   :  { %286 = vmatpush.msrb.mxu0 %v1441_v43  ;;  %306 = vmatpush.msrb.mxu1 %v1443_v44 }
  0x40   :  { %326 = vmatpush.msrb.mxu2 %v1435_v41  ;;  %346 = vmatpush.msrb.mxu3 %v1437_v42 }
  0x41   :  { %287 = vmatpush.msrb.mxu0 %v1456_v48  ;;  %307 = vmatpush.msrb.mxu1 %v1460_v49 }
  0x42   :  { %327 = vmatpush.msrb.mxu2 %v1447_v45  ;;  %347 = vmatpush.msrb.mxu3 %v1449_v46 }
  0x43   :  { %288 = vmatpush.msrb.mxu0 %v1468_v52  ;;  %308 = vmatpush.msrb.mxu1 %v1471_v53 }
  0x44   :  { %328 = vmatpush.msrb.mxu2 %v1462_v50  ;;  %348 = vmatpush.msrb.mxu3 %v1466_v51 }
  0x45   :  { %289 = vmatpush.msrb.mxu0 %v1479_v56  ;;  %309 = vmatpush.msrb.mxu1 %v1483_v57 }
  0x46   :  { %329 = vmatpush.msrb.mxu2 %v1473_v54  ;;  %349 = vmatpush.msrb.mxu3 %v2357_v58 }
  0x47   :  { %290 = vmatpush.msrb.mxu0 %v1491_v60  ;;  %310 = vmatpush.msrb.mxu1 %v1495_v61 }
  0x48   :  { %330 = vmatpush.msrb.mxu2 %v2358_v63  ;;  %350 = vmatpush.msrb.mxu3 %v1489_v59 }
  0x49   :  { %291 = vmatpush.msrb.mxu0 %v1510_v47  ;;  %311 = vmatpush.msrb.mxu1 %v1512_v55 }
  0x4a   :  { %331 = vmatpush.msrb.mxu2 %v1497_v62  ;;  %351 = vmatpush.msrb.mxu3 %v2359_v0 }
  0x4b   :  { %392 = vmatpush.msra.mxu0 %v1323_v3  ;;  %412 = vmatpush.msra.mxu1 %v1327_v4 }
  0x4c   :  { %432 = vmatpush.msra.mxu2 %v1319_v1  ;;  %452 = vmatpush.msra.mxu3 %v1321_v2 }
  0x4d   :  { %393 = vmatpush.msra.mxu0 %v1335_v7  ;;  %413 = vmatpush.msra.mxu1 %v1337_v8 }
  0x4e   :  { %433 = vmatpush.msra.mxu2 %v1329_v5  ;;  %453 = vmatpush.msra.mxu3 %v1331_v6 }
  0x4f   :  { %394 = vmatpush.msra.mxu0 %v1345_v11  ;;  %414 = vmatpush.msra.mxu1 %v1347_v12 }
  0x50   :  { %434 = vmatpush.msra.mxu2 %v1339_v9  ;;  %454 = vmatpush.msra.mxu3 %v1343_v10 }
  0x51   :  { %395 = vmatpush.msra.mxu0 %v1357_v15  ;;  %415 = vmatpush.msra.mxu1 %v1359_v16 }
  0x52   :  { %435 = vmatpush.msra.mxu2 %v1351_v13  ;;  %455 = vmatpush.msra.mxu3 %v1353_v14 }
  0x53   :  { %396 = vmatpush.msra.mxu0 %v1369_v19  ;;  %416 = vmatpush.msra.mxu1 %v1371_v20 }
  0x54   :  { %436 = vmatpush.msra.mxu2 %v1363_v17  ;;  %456 = vmatpush.msra.mxu3 %v1365_v18 }
  0x55   :  { %397 = vmatpush.msra.mxu0 %v1381_v23  ;;  %417 = vmatpush.msra.mxu1 %v1383_v24 }
  0x56   :  { %437 = vmatpush.msra.mxu2 %v1375_v21  ;;  %457 = vmatpush.msra.mxu3 %v1377_v22 }
  0x57   :  { %398 = vmatpush.msra.mxu0 %v1393_v27  ;;  %418 = vmatpush.msra.mxu1 %v1395_v28 }
  0x58   :  { %438 = vmatpush.msra.mxu2 %v1387_v25  ;;  %458 = vmatpush.msra.mxu3 %v1389_v26 }
  0x59   :  { %399 = vmatpush.msra.mxu0 %v1405_v31  ;;  %419 = vmatpush.msra.mxu1 %v1407_v32 }
  0x5a   :  { %439 = vmatpush.msra.mxu2 %v1399_v29  ;;  %459 = vmatpush.msra.mxu3 %v1401_v30 }
  0x5b   :  { %400 = vmatpush.msra.mxu0 %v1417_v35  ;;  %420 = vmatpush.msra.mxu1 %v1419_v36 }
  0x5c   :  { %440 = vmatpush.msra.mxu2 %v1411_v33  ;;  %460 = vmatpush.msra.mxu3 %v1413_v34 }
  0x5d   :  { %401 = vmatpush.msra.mxu0 %v1429_v39  ;;  %421 = vmatpush.msra.mxu1 %v1431_v40 }
  0x5e   :  { %441 = vmatpush.msra.mxu2 %v1423_v37  ;;  %461 = vmatpush.msra.mxu3 %v1425_v38 }
  0x5f   :  { %402 = vmatpush.msra.mxu0 %v1441_v43  ;;  %422 = vmatpush.msra.mxu1 %v1443_v44 }
  0x60   :  { %442 = vmatpush.msra.mxu2 %v1435_v41  ;;  %462 = vmatpush.msra.mxu3 %v1437_v42 }
  0x61   :  { %403 = vmatpush.msra.mxu0 %v1456_v48  ;;  %423 = vmatpush.msra.mxu1 %v1460_v49 }
  0x62   :  { %443 = vmatpush.msra.mxu2 %v1447_v45  ;;  %463 = vmatpush.msra.mxu3 %v1449_v46 }
  0x63   :  { %404 = vmatpush.msra.mxu0 %v1468_v52  ;;  %424 = vmatpush.msra.mxu1 %v1471_v53 }
  0x64   :  { %444 = vmatpush.msra.mxu2 %v1462_v50  ;;  %464 = vmatpush.msra.mxu3 %v1466_v51 }
  0x65   :  { %405 = vmatpush.msra.mxu0 %v1479_v56  ;;  %425 = vmatpush.msra.mxu1 %v1483_v57 }
  0x66   :  { %445 = vmatpush.msra.mxu2 %v1473_v54  ;;  %465 = vmatpush.msra.mxu3 %v2357_v58  ;;  %v36_v58 = vld [vmem:[%s2224_s1] sm:$0xf] }
  0x67   :  { %406 = vmatpush.msra.mxu0 %v1491_v60  ;;  %426 = vmatpush.msra.mxu1 %v1495_v61  ;;  %v1651_v54 = vperm.slane %v36_v58, 0  ;;  %v1653_v60 = vperm.slane %v36_v58, 1  ;;  %v1664_v61 = vperm.slane %v36_v58, 2  ;;  %v1668_v51 = vperm.slane %v36_v58, 3 }
  0x68   :  { %446 = vmatpush.msra.mxu2 %v2358_v63  ;;  %466 = vmatpush.msra.mxu3 %v1489_v59  ;;  %v37_v59 = vld [vmem:[%s2225_s2] sm:$0xf] }
  0x69   :  { %407 = vmatpush.msra.mxu0 %v1510_v47  ;;  %427 = vmatpush.msra.mxu1 %v1512_v55  ;;  %2360 = vst [vmem:[#allocation27_spill] sm:$0xff] %v1651_v54  ;;  %v1659_v55 = vperm.slane %v37_v59, 0  ;;  %v1671_v53 = vperm.slane %v37_v59, 2  ;;  %v1674_v49 = vperm.slane %v37_v59, 3 }
  0x6a   :  { %447 = vmatpush.msra.mxu2 %v1497_v62  ;;  %467 = vmatpush.msra.mxu3 %v2359_v0  ;;  %2361 = vst [vmem:[#allocation28_spill] sm:$0xff] %v1653_v60  ;;  %v1662_v0 = vperm.slane %v37_v59, 1 }
  0x6b   :  { %2362 = vst [vmem:[#allocation29_spill] sm:$0xff] %v1659_v55 }
  0x6c   :  { %2363 = vst [vmem:[#allocation30_spill] sm:$0xff] %v1662_v0 }
  0x6d   :  { %2364 = vst [vmem:[#allocation31_spill] sm:$0xff] %v1664_v61 }
  0x6e   :  { %2365 = vst [vmem:[#allocation32_spill] sm:$0xff] %v1668_v51 }
  0x6f   :  { %2366 = vst [vmem:[#allocation33_spill] sm:$0xff] %v1671_v53 }
  0x90   :  { %v132_v63 = vpop.permute.xlu0 %131 }
  0x91   :  { %v143_v47 = vmul.f32 %v1651_v54, %v132_v63  ;;  %v144_v62 = vmul.f32 %v1653_v60, %v132_v63  ;;  %v145_v50 = vmul.f32 %v1664_v61, %v132_v63  ;;  %v146_v60 = vmul.f32 %v1668_v51, %v132_v63 }
  0x93   :  { %v156_v57 = vadd.f32 %v1659_v55, %v143_v47  ;;  %v157_v56 = vadd.f32 %v1662_v0, %v144_v62  ;;  %v158_v48 = vadd.f32 %v1671_v53, %v145_v50  ;;  %v159_v0 = vadd.f32 %v1674_v49, %v146_v60 }
  0xa6   :  { %v177_v52 = vpop.f32.mrf.mxu0 }
  0xa7   :  { %v197_v54 = vpop.f32.mrf.mxu1  ;;  %v240_v46 = vadd.f32 %v177_v52, %v156_v57 }
  0xa8   :  { %v241_v45 = vadd.f32 %v197_v54, %v157_v56 }
  0xa9   :  { %1110 = vtanh.f32 %v240_v46 }
  0xaa   :  { %v217_v47 = vpop.f32.mrf.mxu2  ;;  %1112 = vtanh.f32 %v241_v45  ;;  %v237_v58 = vpop.f32.mrf.mxu3 }
  0xab   :  { %v242_v62 = vadd.f32 %v217_v47, %v158_v48  ;;  %v243_v61 = vadd.f32 %v237_v58, %v159_v0  ;;  %v2371_v0 = vld [vmem:[#allocation7_spill] sm:$0xff]  ;;  %v2373_v58 = vld [vmem:[#allocation13_spill] sm:$0xff] }
  0xad   :  { %1114 = vtanh.f32 %v242_v62  ;;  %v2372_v62 = vld [vmem:[#allocation8_spill] sm:$0xff] }
  0xae   :  { %1116 = vtanh.f32 %v243_v61  ;;  %v2370_v61 = vld [vmem:[#allocation10_spill] sm:$0xff] }
  0xaf   :  { %v1111_v55 = vpop.eup %1110 }
  0xb0   :  { %v1113_v42 = vpop.eup %1112  ;;  %v248_v41 = vmul.f32 0.5, %v1111_v55  ;;  %v2369_v55 = vld [vmem:[#allocation9_spill] sm:$0xff] }
  0xb1   :  { %v249_v52 = vmul.f32 0.5, %v1113_v42  ;;  %v2368_v42 = vld [vmem:[#allocation6_spill] sm:$0xff] }
  0xb2   :  { %v252_v56 = vadd.f32 0.5, %v248_v41  ;;  %v2367_v41 = vld [vmem:[#allocation5_spill] sm:$0xff] }
  0xb3   :  { %v1115_v54 = vpop.eup %1114  ;;  %v253_v57 = vadd.f32 0.5, %v249_v52  ;;  %v2374_v52 = vld [vmem:[#allocation14_spill] sm:$0xff] }
  0xb4   :  { %v257_v59 = vmul.f32 %v1115_v54, %v252_v56  ;;  %v1117_v50 = vpop.eup %1116  ;;  %v2375_v54 = vld [vmem:[#allocation11_spill] sm:$0xff]  ;;  %v2376_v56 = vld [vmem:[#allocation12_spill] sm:$0xff] }
  0xb5   :  { %v256_v63 = vmul.f32 0.0, %v253_v57  ;;  %v251_v45 = vmul.f32 0.5, %v1117_v50  ;;  %v2377_v57 = vld [vmem:[#allocation17_spill] sm:$0xff]  ;;  %v2380_v50 = vld [vmem:[#allocation16_spill] sm:$0xff] }
  0xb7   :  { %v1678_v46 = vadd.f32 %v257_v59, %v256_v63  ;;  %v255_v48 = vadd.f32 0.5, %v251_v45  ;;  %v2378_v59 = vld [vmem:[#allocation18_spill] sm:$0xff]  ;;  %v2379_v63 = vld [vmem:[#allocation15_spill] sm:$0xff]  ;;  %v2381_v45 = vld [vmem:[#allocation21_spill] sm:$0xff] }
  0xb9   :  { %1118 = vtanh.f32 %v1678_v46 }
  0xbf   :  { %v1119_v60 = vpop.eup %1118 }
  0xc0   :  { %v260_v47 = vmul.f32 %v1119_v60, %v255_v48  ;;  %v2382_v48 = vld [vmem:[#allocation22_spill] sm:$0xff]  ;;  %v2383_v60 = vld [vmem:[#allocation19_spill] sm:$0xff] }
  0xc2   :  { %292 = vmatmul.f32.vlgmr.msrb.gmra.mxu0 %v260_v47  ;;  %312 = vmatmul.f32.vlgmr.msrb.gmra.mxu1 %v260_v47 }
  0xc3   :  { %332 = vmatmul.f32.vlgmr.msrb.gmra.mxu2 %v260_v47  ;;  %352 = vmatmul.f32.vlgmr.msrb.gmra.mxu3 %v260_v47  ;;  %v2384_v47 = vld [vmem:[#allocation20_spill] sm:$0xff] }
  0xc4   :  { %508 = vmatpush.msrb.mxu0 %v1323_v3  ;;  %528 = vmatpush.msrb.mxu1 %v1327_v4 }
  0xc5   :  { %548 = vmatpush.msrb.mxu2 %v1319_v1  ;;  %568 = vmatpush.msrb.mxu3 %v1321_v2 }
  0xc6   :  { %509 = vmatpush.msrb.mxu0 %v1335_v7  ;;  %529 = vmatpush.msrb.mxu1 %v1337_v8 }
  0xc7   :  { %549 = vmatpush.msrb.mxu2 %v1329_v5  ;;  %569 = vmatpush.msrb.mxu3 %v1331_v6 }
  0xc8   :  { %510 = vmatpush.msrb.mxu0 %v1345_v11  ;;  %530 = vmatpush.msrb.mxu1 %v1347_v12 }
  0xc9   :  { %550 = vmatpush.msrb.mxu2 %v1339_v9  ;;  %570 = vmatpush.msrb.mxu3 %v1343_v10 }
  0xca   :  { %511 = vmatpush.msrb.mxu0 %v1357_v15  ;;  %531 = vmatpush.msrb.mxu1 %v1359_v16 }
  0xcb   :  { %551 = vmatpush.msrb.mxu2 %v1351_v13  ;;  %571 = vmatpush.msrb.mxu3 %v1353_v14 }
  0xcc   :  { %512 = vmatpush.msrb.mxu0 %v1369_v19  ;;  %532 = vmatpush.msrb.mxu1 %v1371_v20 }
  0xcd   :  { %552 = vmatpush.msrb.mxu2 %v1363_v17  ;;  %572 = vmatpush.msrb.mxu3 %v1365_v18 }
  0xce   :  { %513 = vmatpush.msrb.mxu0 %v1381_v23  ;;  %533 = vmatpush.msrb.mxu1 %v1383_v24 }
  0xcf   :  { %553 = vmatpush.msrb.mxu2 %v1375_v21  ;;  %573 = vmatpush.msrb.mxu3 %v1377_v22 }
  0xd0   :  { %514 = vmatpush.msrb.mxu0 %v1393_v27  ;;  %534 = vmatpush.msrb.mxu1 %v1395_v28 }
  0xd1   :  { %554 = vmatpush.msrb.mxu2 %v1387_v25  ;;  %574 = vmatpush.msrb.mxu3 %v1389_v26 }
  0xd2   :  { %515 = vmatpush.msrb.mxu0 %v1405_v31  ;;  %535 = vmatpush.msrb.mxu1 %v1407_v32 }
  0xd3   :  { %555 = vmatpush.msrb.mxu2 %v1399_v29  ;;  %575 = vmatpush.msrb.mxu3 %v1401_v30 }
  0xd4   :  { %516 = vmatpush.msrb.mxu0 %v1417_v35  ;;  %536 = vmatpush.msrb.mxu1 %v1419_v36 }
  0xd5   :  { %556 = vmatpush.msrb.mxu2 %v1411_v33  ;;  %576 = vmatpush.msrb.mxu3 %v1413_v34 }
  0xd6   :  { %517 = vmatpush.msrb.mxu0 %v1429_v39  ;;  %537 = vmatpush.msrb.mxu1 %v1431_v40 }
  0xd7   :  { %557 = vmatpush.msrb.mxu2 %v1423_v37  ;;  %577 = vmatpush.msrb.mxu3 %v1425_v38 }
  0xd8   :  { %518 = vmatpush.msrb.mxu0 %v1441_v43  ;;  %538 = vmatpush.msrb.mxu1 %v1443_v44 }
  0xd9   :  { %558 = vmatpush.msrb.mxu2 %v2367_v41  ;;  %578 = vmatpush.msrb.mxu3 %v2368_v42 }
  0xda   :  { %519 = vmatpush.msrb.mxu0 %v2369_v55  ;;  %539 = vmatpush.msrb.mxu1 %v2370_v61  ;;  %v2393_v55 = vld [vmem:[#allocation31_spill] sm:$0xff] }
  0xdb   :  { %559 = vmatpush.msrb.mxu2 %v2371_v0  ;;  %579 = vmatpush.msrb.mxu3 %v2372_v62  ;;  %v2392_v62 = vld [vmem:[#allocation30_spill] sm:$0xff] }
  0xdc   :  { %520 = vmatpush.msrb.mxu0 %v2373_v58  ;;  %540 = vmatpush.msrb.mxu1 %v2374_v52  ;;  %v2385_v52 = vld [vmem:[#allocation25_spill] sm:$0xff] }
  0xdd   :  { %560 = vmatpush.msrb.mxu2 %v2375_v54  ;;  %580 = vmatpush.msrb.mxu3 %v2376_v56  ;;  %v2386_v54 = vld [vmem:[#allocation26_spill] sm:$0xff]  ;;  %v2387_v56 = vld [vmem:[#allocation23_spill] sm:$0xff]  ;;  %v2391_v58 = vld [vmem:[#allocation29_spill] sm:$0xff] }
  0xde   :  { %521 = vmatpush.msrb.mxu0 %v2377_v57  ;;  %541 = vmatpush.msrb.mxu1 %v2378_v59  ;;  %v2388_v57 = vld [vmem:[#allocation24_spill] sm:$0xff] }
  0xdf   :  { %561 = vmatpush.msrb.mxu2 %v2379_v63  ;;  %581 = vmatpush.msrb.mxu3 %v2380_v50  ;;  %v1094_v50 = vld [vmem:[%s2223_s0 + $0x4] sm:$0x3]  ;;  %v2389_v63 = vld [vmem:[#allocation27_spill] sm:$0xff]  ;;  %v2390_v59 = vld [vmem:[#allocation28_spill] sm:$0xff] }
  0xe0   :  { %522 = vmatpush.msrb.mxu0 %v2381_v45  ;;  %542 = vmatpush.msrb.mxu1 %v2382_v48  ;;  %v266_v45 = vpop.permute.xlu0 %265 }
  0xe1   :  { %562 = vmatpush.msrb.mxu2 %v2383_v60  ;;  %582 = vmatpush.msrb.mxu3 %v2384_v47  ;;  %v268_v48 = vmul.f32 %v266_v45, %v2389_v63  ;;  %v269_v60 = vmul.f32 %v266_v45, %v2390_v59  ;;  %v271_v63 = vmul.f32 %v266_v45, %v1668_v51 }
  0xe2   :  { %523 = vmatpush.msrb.mxu0 %v2385_v52  ;;  %543 = vmatpush.msrb.mxu1 %v2386_v54 }
  0xe3   :  { %563 = vmatpush.msrb.mxu2 %v2387_v56  ;;  %583 = vmatpush.msrb.mxu3 %v2388_v57  ;;  %v272_v47 = vadd.f32 %v268_v48, %v2391_v58  ;;  %v273_v52 = vadd.f32 %v269_v60, %v2392_v62  ;;  %v1095_v56 = vld [vmem:[%s2223_s0 + $0x6] sm:$0x3]  ;;  %v1099_v48 = vld [vmem:[%s2223_s0 + $0xe] sm:$0x3]  ;;  %v275_v58 = vadd.f32 %v271_v63, %v1674_v49 }
  0xe4   :  { %381 = vperm.xlu1 %1107, %v1094_v50   ;;  %v270_v50 = vmul.f32 %v266_v45, %v2393_v55 }
  0xe6   :  { %v274_v60 = vadd.f32 %v270_v50, %v1671_v53 }
  0xec   :  { %497 = vperm.xlu1 %1107, %v1095_v56  }
  0xf4   :  { %961 = vperm.xlu1 %1107, %v1099_v48  }
 0x13f   :  { %v293_v54 = vpop.f32.mrf.mxu0  ;;  %v313_v57 = vpop.f32.mrf.mxu1 }
 0x140   :  { %v356_v0 = vadd.f32 %v293_v54, %v272_v47  ;;  %v357_v61 = vadd.f32 %v313_v57, %v273_v52 }
 0x142   :  { %1120 = vtanh.f32 %v356_v0 }
 0x143   :  { %1122 = vtanh.f32 %v357_v61 }
 0x146   :  { %v333_v62 = vpop.f32.mrf.mxu2  ;;  %v353_v59 = vpop.f32.mrf.mxu3 }
 0x147   :  { %v358_v42 = vadd.f32 %v333_v62, %v274_v60  ;;  %v359_v52 = vadd.f32 %v353_v59, %v275_v58 }
 0x148   :  { %v1121_v54 = vpop.eup %1120 }
 0x149   :  { %v1123_v56 = vpop.eup %1122  ;;  %1124 = vtanh.f32 %v358_v42  ;;  %v364_v0 = vmul.f32 0.5, %v1121_v54  ;;  %v2419_v54 = vld [vmem:[#allocation31_spill] sm:$0xff] }
 0x14a   :  { %v365_v57 = vmul.f32 0.5, %v1123_v56  ;;  %1126 = vtanh.f32 %v359_v52  ;;  %v2420_v56 = vld [vmem:[#allocation32_spill] sm:$0xff] }
 0x14b   :  { %v368_v61 = vadd.f32 0.5, %v364_v0 }
 0x14c   :  { %v369_v45 = vadd.f32 0.5, %v365_v57  ;;  %v2421_v57 = vld [vmem:[#allocation33_spill] sm:$0xff] }
 0x14e   :  { %v372_v51 = vmul.f32 %v369_v45, %v1678_v46 }
 0x14f   :  { %v1125_v47 = vpop.eup %1124 }
 0x150   :  { %v373_v55 = vmul.f32 %v1125_v47, %v368_v61  ;;  %v1127_v50 = vpop.eup %1126 }
 0x151   :  { %v367_v62 = vmul.f32 0.5, %v1127_v50 }
 0x152   :  { %v1763_v53 = vadd.f32 %v373_v55, %v372_v51  ;;  %v2418_v51 = vld [vmem:[#allocation30_spill] sm:$0xff] }
 0x153   :  { %v371_v63 = vadd.f32 0.5, %v367_v62 }
 0x154   :  { %1128 = vtanh.f32 %v1763_v53 }
 0x15a   :  { %v1129_v48 = vpop.eup %1128 }
 0x15b   :  { %v376_v58 = vmul.f32 %v1129_v48, %v371_v63 }
 0x15d   :  { %408 = vmatmul.f32.vlgmr.msra.gmra.mxu0 %v376_v58  ;;  %428 = vmatmul.f32.vlgmr.msra.gmra.mxu1 %v376_v58 }
 0x15e   :  { %448 = vmatmul.f32.vlgmr.msra.gmra.mxu2 %v376_v58  ;;  %468 = vmatmul.f32.vlgmr.msra.gmra.mxu3 %v376_v58 }
 0x15f   :  { %624 = vmatpush.msra.mxu0 %v1323_v3  ;;  %644 = vmatpush.msra.mxu1 %v1327_v4  ;;  %v2396_v3 = vld [vmem:[#allocation10_spill] sm:$0xff]  ;;  %v2397_v4 = vld [vmem:[#allocation7_spill] sm:$0xff] }
 0x160   :  { %664 = vmatpush.msra.mxu2 %v1319_v1  ;;  %684 = vmatpush.msra.mxu3 %v1321_v2  ;;  %v2394_v1 = vld [vmem:[#allocation6_spill] sm:$0xff]  ;;  %v2395_v2 = vld [vmem:[#allocation9_spill] sm:$0xff] }
 0x161   :  { %625 = vmatpush.msra.mxu0 %v1335_v7  ;;  %645 = vmatpush.msra.mxu1 %v1337_v8  ;;  %v2400_v7 = vld [vmem:[#allocation14_spill] sm:$0xff]  ;;  %v2401_v8 = vld [vmem:[#allocation11_spill] sm:$0xff] }
 0x162   :  { %665 = vmatpush.msra.mxu2 %v1329_v5  ;;  %685 = vmatpush.msra.mxu3 %v1331_v6  ;;  %v2398_v5 = vld [vmem:[#allocation8_spill] sm:$0xff]  ;;  %v2399_v6 = vld [vmem:[#allocation13_spill] sm:$0xff] }
 0x163   :  { %626 = vmatpush.msra.mxu0 %v1345_v11  ;;  %646 = vmatpush.msra.mxu1 %v1347_v12  ;;  %v2404_v11 = vld [vmem:[#allocation18_spill] sm:$0xff]  ;;  %v2405_v12 = vld [vmem:[#allocation15_spill] sm:$0xff] }
 0x164   :  { %666 = vmatpush.msra.mxu2 %v1339_v9  ;;  %686 = vmatpush.msra.mxu3 %v1343_v10  ;;  %v2402_v9 = vld [vmem:[#allocation12_spill] sm:$0xff]  ;;  %v2403_v10 = vld [vmem:[#allocation17_spill] sm:$0xff] }
 0x165   :  { %627 = vmatpush.msra.mxu0 %v1357_v15  ;;  %647 = vmatpush.msra.mxu1 %v1359_v16  ;;  %v2408_v15 = vld [vmem:[#allocation22_spill] sm:$0xff]  ;;  %v2409_v16 = vld [vmem:[#allocation19_spill] sm:$0xff] }
 0x166   :  { %667 = vmatpush.msra.mxu2 %v1351_v13  ;;  %687 = vmatpush.msra.mxu3 %v1353_v14  ;;  %v2406_v13 = vld [vmem:[#allocation16_spill] sm:$0xff]  ;;  %v2407_v14 = vld [vmem:[#allocation21_spill] sm:$0xff] }
 0x167   :  { %628 = vmatpush.msra.mxu0 %v1369_v19  ;;  %648 = vmatpush.msra.mxu1 %v1371_v20  ;;  %v2412_v19 = vld [vmem:[#allocation26_spill] sm:$0xff]  ;;  %v2413_v20 = vld [vmem:[#allocation23_spill] sm:$0xff] }
 0x168   :  { %668 = vmatpush.msra.mxu2 %v1363_v17  ;;  %688 = vmatpush.msra.mxu3 %v1365_v18  ;;  %v2410_v17 = vld [vmem:[#allocation20_spill] sm:$0xff]  ;;  %v2411_v18 = vld [vmem:[#allocation25_spill] sm:$0xff] }
 0x169   :  { %629 = vmatpush.msra.mxu0 %v1381_v23  ;;  %649 = vmatpush.msra.mxu1 %v1383_v24  ;;  %v2415_v23 = vld [vmem:[#allocation27_spill] sm:$0xff] }
 0x16a   :  { %669 = vmatpush.msra.mxu2 %v1375_v21  ;;  %689 = vmatpush.msra.mxu3 %v1377_v22  ;;  %v2414_v21 = vld [vmem:[#allocation24_spill] sm:$0xff]  ;;  %v382_v22 = vpop.permute.xlu1 %381 }
 0x16b   :  { %630 = vmatpush.msra.mxu0 %v1393_v27  ;;  %650 = vmatpush.msra.mxu1 %v1395_v28  ;;  %v384_v24 = vmul.f32 %v382_v22, %v2415_v23  ;;  %v386_v52 = vmul.f32 %v382_v22, %v2419_v54  ;;  %v387_v0 = vmul.f32 %v382_v22, %v2420_v56 }
 0x16c   :  { %670 = vmatpush.msra.mxu2 %v1387_v25  ;;  %690 = vmatpush.msra.mxu3 %v1389_v26  ;;  %v2416_v25 = vld [vmem:[#allocation28_spill] sm:$0xff] }
 0x16d   :  { %631 = vmatpush.msra.mxu0 %v1405_v31  ;;  %651 = vmatpush.msra.mxu1 %v1407_v32  ;;  %v385_v26 = vmul.f32 %v382_v22, %v2416_v25  ;;  %v390_v45 = vadd.f32 %v386_v52, %v2421_v57  ;;  %v391_v47 = vadd.f32 %v387_v0, %v1674_v49 }
 0x16e   :  { %671 = vmatpush.msra.mxu2 %v1399_v29  ;;  %691 = vmatpush.msra.mxu3 %v1401_v30  ;;  %v2417_v29 = vld [vmem:[#allocation29_spill] sm:$0xff] }
 0x16f   :  { %632 = vmatpush.msra.mxu0 %v1417_v35  ;;  %652 = vmatpush.msra.mxu1 %v1419_v36  ;;  %v388_v30 = vadd.f32 %v384_v24, %v2417_v29  ;;  %v389_v46 = vadd.f32 %v385_v26, %v2418_v51 }
 0x170   :  { %672 = vmatpush.msra.mxu2 %v1411_v33  ;;  %692 = vmatpush.msra.mxu3 %v1413_v34 }
 0x171   :  { %633 = vmatpush.msra.mxu0 %v1429_v39  ;;  %653 = vmatpush.msra.mxu1 %v1431_v40 }
 0x172   :  { %673 = vmatpush.msra.mxu2 %v1423_v37  ;;  %693 = vmatpush.msra.mxu3 %v1425_v38 }
 0x173   :  { %634 = vmatpush.msra.mxu0 %v1441_v43  ;;  %654 = vmatpush.msra.mxu1 %v1443_v44 }
 0x174   :  { %674 = vmatpush.msra.mxu2 %v2367_v41  ;;  %694 = vmatpush.msra.mxu3 %v2394_v1 }
 0x175   :  { %635 = vmatpush.msra.mxu0 %v2395_v2  ;;  %655 = vmatpush.msra.mxu1 %v2396_v3 }
 0x176   :  { %675 = vmatpush.msra.mxu2 %v2397_v4  ;;  %695 = vmatpush.msra.mxu3 %v2398_v5 }
 0x177   :  { %636 = vmatpush.msra.mxu0 %v2399_v6  ;;  %656 = vmatpush.msra.mxu1 %v2400_v7 }
 0x178   :  { %676 = vmatpush.msra.mxu2 %v2401_v8  ;;  %696 = vmatpush.msra.mxu3 %v2402_v9 }
 0x179   :  { %637 = vmatpush.msra.mxu0 %v2403_v10  ;;  %657 = vmatpush.msra.mxu1 %v2404_v11 }
 0x17a   :  { %677 = vmatpush.msra.mxu2 %v2405_v12  ;;  %697 = vmatpush.msra.mxu3 %v2406_v13 }
 0x17b   :  { %638 = vmatpush.msra.mxu0 %v2407_v14  ;;  %658 = vmatpush.msra.mxu1 %v2408_v15 }
 0x17c   :  { %678 = vmatpush.msra.mxu2 %v2409_v16  ;;  %698 = vmatpush.msra.mxu3 %v2410_v17 }
 0x17d   :  { %639 = vmatpush.msra.mxu0 %v2411_v18  ;;  %659 = vmatpush.msra.mxu1 %v2412_v19 }
 0x17e   :  { %679 = vmatpush.msra.mxu2 %v2413_v20  ;;  %699 = vmatpush.msra.mxu3 %v2414_v21 }
 0x1da   :  { %v409_v42 = vpop.f32.mrf.mxu0  ;;  %v429_v55 = vpop.f32.mrf.mxu1 }
 0x1db   :  { %v472_v59 = vadd.f32 %v409_v42, %v388_v30  ;;  %v473_v60 = vadd.f32 %v429_v55, %v389_v46 }
 0x1dd   :  { %1130 = vtanh.f32 %v472_v59 }
 0x1de   :  { %1132 = vtanh.f32 %v473_v60 }
 0x1e1   :  { %v449_v61 = vpop.f32.mrf.mxu2  ;;  %v469_v50 = vpop.f32.mrf.mxu3 }
 0x1e2   :  { %v474_v62 = vadd.f32 %v449_v61, %v390_v45  ;;  %v475_v48 = vadd.f32 %v469_v50, %v391_v47  ;;  %v1842_v47 = vld [vmem:[#allocation2 + $0x1e0] sm:$0xff]  ;;  %v1845_v50 = vld [vmem:[#allocation2 + $0x1e8] sm:$0xff] }
 0x1e3   :  { %v1131_v63 = vpop.eup %1130 }
 0x1e4   :  { %v1133_v58 = vpop.eup %1132  ;;  %1134 = vtanh.f32 %v474_v62  ;;  %v480_v24 = vmul.f32 0.5, %v1131_v63  ;;  %v1851_v62 = vld [vmem:[#allocation2 + $0x1f8] sm:$0xff]  ;;  %v1854_v63 = vld [vmem:[#allocation2 + $0x1c0] sm:$0xff] }
 0x1e5   :  { %v481_v26 = vmul.f32 0.5, %v1133_v58  ;;  %1136 = vtanh.f32 %v475_v48  ;;  %v1857_v48 = vld [vmem:[#allocation2 + $0x1c8] sm:$0xff]  ;;  %v1860_v58 = vld [vmem:[#allocation2 + $0x1d0] sm:$0xff] }
 0x1e6   :  { %v484_v46 = vadd.f32 0.5, %v480_v24  ;;  %v1863_v24 = vld [vmem:[#allocation2 + $0x1d8] sm:$0xff] }
 0x1e7   :  { %v485_v30 = vadd.f32 0.5, %v481_v26  ;;  %v1866_v26 = vld [vmem:[#allocation2 + $0x1a0] sm:$0xff] }
 0x1e9   :  { %v488_v22 = vmul.f32 %v485_v30, %v1763_v53  ;;  %v1848_v53 = vld [vmem:[#allocation2 + $0x1f0] sm:$0xff]  ;;  %v1869_v30 = vld [vmem:[#allocation2 + $0x1a8] sm:$0xff] }
 0x1ea   :  { %v1135_v42 = vpop.eup %1134 }
 0x1eb   :  { %v489_v55 = vmul.f32 %v1135_v42, %v484_v46  ;;  %v1137_v59 = vpop.eup %1136  ;;  %v1872_v46 = vld [vmem:[#allocation2 + $0x1b0] sm:$0xff]  ;;  %v1875_v42 = vld [vmem:[#allocation2 + $0x1b8] sm:$0xff] }
 0x1ec   :  { %v483_v52 = vmul.f32 0.5, %v1137_v59  ;;  %v1884_v59 = vld [vmem:[#allocation2 + $0x190] sm:$0xff] }
 0x1ed   :  { %v1839_v60 = vadd.f32 %v489_v55, %v488_v22  ;;  %v1878_v22 = vld [vmem:[#allocation2 + $0x180] sm:$0xff]  ;;  %v1881_v55 = vld [vmem:[#allocation2 + $0x188] sm:$0xff]  ;;  %2423 = vst [vmem:[#allocation6_spill] sm:$0xff] %v1884_v59 }
 0x1ee   :  { %v487_v0 = vadd.f32 0.5, %v483_v52  ;;  %2422 = vst [vmem:[#allocation5_spill] sm:$0xff] %v1881_v55  ;;  %v1887_v52 = vld [vmem:[#allocation2 + $0x198] sm:$0xff] }
 0x1ef   :  { %1138 = vtanh.f32 %v1839_v60  ;;  %2424 = vst [vmem:[#allocation9_spill] sm:$0xff] %v1887_v52 }
 0x1f5   :  { %v1139_v45 = vpop.eup %1138 }
 0x1f6   :  { %v492_v61 = vmul.f32 %v1139_v45, %v487_v0  ;;  %v1890_v0 = vld [vmem:[#allocation2 + $0x160] sm:$0xff]  ;;  %v1893_v45 = vld [vmem:[#allocation2 + $0x168] sm:$0xff] }
 0x1f7   :  { %2425 = vst [vmem:[#allocation10_spill] sm:$0xff] %v1890_v0 }
 0x1f8   :  { %524 = vmatmul.f32.vlgmr.msrb.gmra.mxu0 %v492_v61  ;;  %544 = vmatmul.f32.vlgmr.msrb.gmra.mxu1 %v492_v61  ;;  %2426 = vst [vmem:[#allocation7_spill] sm:$0xff] %v1893_v45 }
 0x1f9   :  { %564 = vmatmul.f32.vlgmr.msrb.gmra.mxu2 %v492_v61  ;;  %584 = vmatmul.f32.vlgmr.msrb.gmra.mxu3 %v492_v61  ;;  %v1896_v61 = vld [vmem:[#allocation2 + $0x170] sm:$0xff] }
 0x1fa   :  { %740 = vmatpush.msrb.mxu0 %v1842_v47  ;;  %760 = vmatpush.msrb.mxu1 %v1845_v50 }
 0x1fb   :  { %780 = vmatpush.msrb.mxu2 %v1848_v53  ;;  %800 = vmatpush.msrb.mxu3 %v1851_v62 }
 0x1fc   :  { %741 = vmatpush.msrb.mxu0 %v1854_v63  ;;  %761 = vmatpush.msrb.mxu1 %v1857_v48 }
 0x1fd   :  { %781 = vmatpush.msrb.mxu2 %v1860_v58  ;;  %801 = vmatpush.msrb.mxu3 %v1863_v24 }
 0x1fe   :  { %742 = vmatpush.msrb.mxu0 %v1866_v26  ;;  %762 = vmatpush.msrb.mxu1 %v1869_v30 }
 0x1ff   :  { %782 = vmatpush.msrb.mxu2 %v1872_v46  ;;  %802 = vmatpush.msrb.mxu3 %v1875_v42 }
 0x200   :  { %743 = vmatpush.msrb.mxu0 %v1878_v22  ;;  %763 = vmatpush.msrb.mxu1 %v1881_v55  ;;  %v1899_v55 = vld [vmem:[#allocation2 + $0x178] sm:$0xff] }
 0x201   :  { %783 = vmatpush.msrb.mxu2 %v1884_v59  ;;  %803 = vmatpush.msrb.mxu3 %v1887_v52  ;;  %2427 = vst [vmem:[#allocation8_spill] sm:$0xff] %v1899_v55  ;;  %v1902_v59 = vld [vmem:[#allocation2 + $0x140] sm:$0xff]  ;;  %v1905_v52 = vld [vmem:[#allocation2 + $0x148] sm:$0xff] }
 0x202   :  { %744 = vmatpush.msrb.mxu0 %v1890_v0  ;;  %764 = vmatpush.msrb.mxu1 %v1893_v45  ;;  %2428 = vst [vmem:[#allocation13_spill] sm:$0xff] %v1902_v59  ;;  %v1908_v0 = vld [vmem:[#allocation2 + $0x150] sm:$0xff]  ;;  %v1911_v45 = vld [vmem:[#allocation2 + $0x158] sm:$0xff] }
 0x203   :  { %784 = vmatpush.msrb.mxu2 %v1896_v61  ;;  %804 = vmatpush.msrb.mxu3 %v1899_v55  ;;  %2429 = vst [vmem:[#allocation14_spill] sm:$0xff] %v1908_v0  ;;  %v1916_v55 = vld [vmem:[#allocation2 + $0x130] sm:$0xff] }
 0x204   :  { %745 = vmatpush.msrb.mxu0 %v1902_v59  ;;  %765 = vmatpush.msrb.mxu1 %v1905_v52  ;;  %2430 = vst [vmem:[#allocation11_spill] sm:$0xff] %v1911_v45  ;;  %v1919_v59 = vld [vmem:[#allocation2 + $0x138] sm:$0xff] }
 0x205   :  { %785 = vmatpush.msrb.mxu2 %v1908_v0  ;;  %805 = vmatpush.msrb.mxu3 %v1911_v45  ;;  %v1924_v0 = vld [vmem:[#allocation2 + $0x110] sm:$0xff]  ;;  %v1927_v45 = vld [vmem:[#allocation2 + $0x118] sm:$0xff] }
 0x206   :  { %746 = vmatpush.msrb.mxu0 %v1393_v27  ;;  %766 = vmatpush.msrb.mxu1 %v1395_v28  ;;  %v498_v27 = vpop.permute.xlu1 %497 }
 0x207   :  { %786 = vmatpush.msrb.mxu2 %v1916_v55  ;;  %806 = vmatpush.msrb.mxu3 %v1919_v59  ;;  %v500_v28 = vmul.f32 %v498_v27, %v2415_v23 }
 0x208   :  { %747 = vmatpush.msrb.mxu0 %v1405_v31  ;;  %767 = vmatpush.msrb.mxu1 %v1407_v32  ;;  %v501_v31 = vmul.f32 %v498_v27, %v2416_v25 }
 0x209   :  { %787 = vmatpush.msrb.mxu2 %v1924_v0  ;;  %807 = vmatpush.msrb.mxu3 %v1927_v45  ;;  %v504_v32 = vadd.f32 %v500_v28, %v2417_v29  ;;  %v2435_v28 = vld [vmem:[#allocation7_spill] sm:$0xff] }
 0x20a   :  { %748 = vmatpush.msrb.mxu0 %v1417_v35  ;;  %768 = vmatpush.msrb.mxu1 %v1419_v36 }
 0x20b   :  { %788 = vmatpush.msrb.mxu2 %v1411_v33  ;;  %808 = vmatpush.msrb.mxu3 %v1413_v34  ;;  %v505_v33 = vadd.f32 %v501_v31, %v2418_v51  ;;  %v1096_v34 = vld [vmem:[%s2223_s0 + $0x8] sm:$0x3]  ;;  %v2436_v31 = vld [vmem:[#allocation8_spill] sm:$0xff] }
 0x20c   :  { %749 = vmatpush.msrb.mxu0 %v1429_v39  ;;  %769 = vmatpush.msrb.mxu1 %v1431_v40  ;;  %v502_v39 = vmul.f32 %v498_v27, %v2419_v54  ;;  %v503_v40 = vmul.f32 %v498_v27, %v2420_v56  ;;  %v2434_v27 = vld [vmem:[#allocation10_spill] sm:$0xff] }
 0x20d   :  { %789 = vmatpush.msrb.mxu2 %v1423_v37  ;;  %809 = vmatpush.msrb.mxu3 %v1425_v38 }
 0x20e   :  { %750 = vmatpush.msrb.mxu0 %v1441_v43  ;;  %770 = vmatpush.msrb.mxu1 %v1443_v44  ;;  %v1097_v43 = vld [vmem:[%s2223_s0 + $0xa] sm:$0x3]  ;;  %v506_v44 = vadd.f32 %v502_v39, %v2421_v57  ;;  %v2020_v39 = vld [vmem:[#allocation2 + $0xe0] sm:$0xff] }
 0x20f   :  { %790 = vmatpush.msrb.mxu2 %v2367_v41  ;;  %810 = vmatpush.msrb.mxu3 %v2394_v1  ;;  %v507_v1 = vadd.f32 %v503_v40, %v1674_v49  ;;  %v2023_v40 = vld [vmem:[#allocation2 + $0xe8] sm:$0xff] }
 0x210   :  { %751 = vmatpush.msrb.mxu0 %v2395_v2  ;;  %771 = vmatpush.msrb.mxu1 %v2396_v3 }
 0x211   :  { %791 = vmatpush.msrb.mxu2 %v2397_v4  ;;  %811 = vmatpush.msrb.mxu3 %v2398_v5 }
 0x212   :  { %752 = vmatpush.msrb.mxu0 %v2399_v6  ;;  %772 = vmatpush.msrb.mxu1 %v2400_v7 }
 0x213   :  { %792 = vmatpush.msrb.mxu2 %v2401_v8  ;;  %812 = vmatpush.msrb.mxu3 %v2402_v9 }
 0x214   :  { %753 = vmatpush.msrb.mxu0 %v2403_v10  ;;  %773 = vmatpush.msrb.mxu1 %v2404_v11 }
 0x215   :  { %793 = vmatpush.msrb.mxu2 %v2405_v12  ;;  %813 = vmatpush.msrb.mxu3 %v2406_v13 }
 0x216   :  { %754 = vmatpush.msrb.mxu0 %v2407_v14  ;;  %774 = vmatpush.msrb.mxu1 %v2408_v15 }
 0x217   :  { %794 = vmatpush.msrb.mxu2 %v2409_v16  ;;  %814 = vmatpush.msrb.mxu3 %v2410_v17 }
 0x218   :  { %755 = vmatpush.msrb.mxu0 %v2411_v18  ;;  %775 = vmatpush.msrb.mxu1 %v2412_v19 }
 0x219   :  { %795 = vmatpush.msrb.mxu2 %v2413_v20  ;;  %815 = vmatpush.msrb.mxu3 %v2414_v21  ;;  %v2431_v20 = vld [vmem:[#allocation5_spill] sm:$0xff]  ;;  %v2432_v21 = vld [vmem:[#allocation6_spill] sm:$0xff] }
 0x21a   :  { %613 = vperm.xlu2 %1108, %v1096_v34   ;;  %v2439_v34 = vld [vmem:[#allocation11_spill] sm:$0xff] }
 0x222   :  { %729 = vperm.xlu2 %1108, %v1097_v43   ;;  %v2026_v43 = vld [vmem:[#allocation2 + $0xf0] sm:$0xff] }
 0x275   :  { %v525_v35 = vpop.f32.mrf.mxu0  ;;  %v545_v36 = vpop.f32.mrf.mxu1 }
 0x276   :  { %v588_v37 = vadd.f32 %v525_v35, %v504_v32  ;;  %v589_v38 = vadd.f32 %v545_v36, %v505_v33  ;;  %v2437_v32 = vld [vmem:[#allocation13_spill] sm:$0xff]  ;;  %v2438_v33 = vld [vmem:[#allocation14_spill] sm:$0xff] }
 0x277   :  { %v2004_v35 = vld [vmem:[#allocation2 + $0x120] sm:$0xff]  ;;  %v2007_v36 = vld [vmem:[#allocation2 + $0x128] sm:$0xff] }
 0x278   :  { %1140 = vtanh.f32 %v588_v37  ;;  %v2012_v37 = vld [vmem:[#allocation2 + $0x100] sm:$0xff] }
 0x279   :  { %1142 = vtanh.f32 %v589_v38  ;;  %v2015_v38 = vld [vmem:[#allocation2 + $0x108] sm:$0xff] }
 0x27c   :  { %v565_v41 = vpop.f32.mrf.mxu2  ;;  %v585_v2 = vpop.f32.mrf.mxu3 }
 0x27d   :  { %v590_v3 = vadd.f32 %v565_v41, %v506_v44  ;;  %v591_v5 = vadd.f32 %v585_v2, %v507_v1  ;;  %v2029_v44 = vld [vmem:[#allocation2 + $0xf8] sm:$0xff]  ;;  %v2032_v41 = vld [vmem:[#allocation2 + $0xc0] sm:$0xff]  ;;  %v2035_v1 = vld [vmem:[#allocation2 + $0xc8] sm:$0xff] }
 0x27e   :  { %v1141_v4 = vpop.eup %1140  ;;  %v2038_v2 = vld [vmem:[#allocation2 + $0xd0] sm:$0xff] }
 0x27f   :  { %v1143_v6 = vpop.eup %1142  ;;  %1144 = vtanh.f32 %v590_v3  ;;  %v596_v7 = vmul.f32 0.5, %v1141_v4  ;;  %v2041_v3 = vld [vmem:[#allocation2 + $0xd8] sm:$0xff]  ;;  %v2044_v4 = vld [vmem:[#allocation2 + $0xa0] sm:$0xff] }
 0x280   :  { %v597_v8 = vmul.f32 0.5, %v1143_v6  ;;  %1146 = vtanh.f32 %v591_v5  ;;  %v2047_v5 = vld [vmem:[#allocation2 + $0xa8] sm:$0xff]  ;;  %v2050_v6 = vld [vmem:[#allocation2 + $0xb0] sm:$0xff] }
 0x281   :  { %v600_v10 = vadd.f32 0.5, %v596_v7  ;;  %2440 = vst [vmem:[#allocation12_spill] sm:$0xff] %v2047_v5  ;;  %v2053_v7 = vld [vmem:[#allocation2 + $0xb8] sm:$0xff] }
 0x282   :  { %v601_v9 = vadd.f32 0.5, %v597_v8  ;;  %2441 = vst [vmem:[#allocation17_spill] sm:$0xff] %v2050_v6  ;;  %v2056_v8 = vld [vmem:[#allocation2 + $0x80] sm:$0xff] }
 0x283   :  { %2442 = vst [vmem:[#allocation18_spill] sm:$0xff] %v2053_v7 }
 0x284   :  { %v604_v12 = vmul.f32 %v601_v9, %v1839_v60  ;;  %v2433_v60 = vld [vmem:[#allocation9_spill] sm:$0xff]  ;;  %2443 = vst [vmem:[#allocation15_spill] sm:$0xff] %v2056_v8  ;;  %v2059_v9 = vld [vmem:[#allocation2 + $0x88] sm:$0xff] }
 0x285   :  { %v1145_v11 = vpop.eup %1144  ;;  %2444 = vst [vmem:[#allocation16_spill] sm:$0xff] %v2059_v9 }
 0x286   :  { %v605_v13 = vmul.f32 %v1145_v11, %v600_v10  ;;  %v1147_v14 = vpop.eup %1146  ;;  %v2062_v10 = vld [vmem:[#allocation2 + $0x90] sm:$0xff]  ;;  %v2065_v11 = vld [vmem:[#allocation2 + $0x98] sm:$0xff] }
 0x287   :  { %v599_v16 = vmul.f32 0.5, %v1147_v14  ;;  %2445 = vst [vmem:[#allocation21_spill] sm:$0xff] %v2062_v10  ;;  %v2074_v14 = vld [vmem:[#allocation2 + $0x70] sm:$0xff] }
 0x288   :  { %v1977_v15 = vadd.f32 %v605_v13, %v604_v12  ;;  %2446 = vst [vmem:[#allocation22_spill] sm:$0xff] %v2065_v11  ;;  %v2068_v12 = vld [vmem:[#allocation2 + $0x60] sm:$0xff]  ;;  %v2071_v13 = vld [vmem:[#allocation2 + $0x68] sm:$0xff] }
 0x289   :  { %v603_v17 = vadd.f32 0.5, %v599_v16  ;;  %2447 = vst [vmem:[#allocation19_spill] sm:$0xff] %v2068_v12  ;;  %v2077_v16 = vld [vmem:[#allocation2 + $0x78] sm:$0xff] }
 0x28a   :  { %1148 = vtanh.f32 %v1977_v15  ;;  %2448 = vst [vmem:[#allocation20_spill] sm:$0xff] %v2071_v13 }
 0x28b   :  { %2449 = vst [vmem:[#allocation25_spill] sm:$0xff] %v2074_v14 }
 0x28c   :  { %2450 = vst [vmem:[#allocation26_spill] sm:$0xff] %v2077_v16 }
 0x290   :  { %v1149_v18 = vpop.eup %1148 }
 0x291   :  { %v608_v19 = vmul.f32 %v1149_v18, %v603_v17  ;;  %v2080_v17 = vld [vmem:[#allocation2 + $0x40] sm:$0xff]  ;;  %v2083_v18 = vld [vmem:[#allocation2 + $0x48] sm:$0xff] }
 0x292   :  { %2451 = vst [vmem:[#allocation23_spill] sm:$0xff] %v2080_v17 }
 0x293   :  { %640 = vmatmul.f32.vlgmr.msra.gmra.mxu0 %v608_v19  ;;  %660 = vmatmul.f32.vlgmr.msra.gmra.mxu1 %v608_v19  ;;  %2452 = vst [vmem:[#allocation24_spill] sm:$0xff] %v2083_v18 }
 0x294   :  { %680 = vmatmul.f32.vlgmr.msra.gmra.mxu2 %v608_v19  ;;  %700 = vmatmul.f32.vlgmr.msra.gmra.mxu3 %v608_v19  ;;  %v2086_v19 = vld [vmem:[#allocation2 + $0x50] sm:$0xff] }
 0x295   :  { %856 = vmatpush.msra.mxu0 %v1842_v47  ;;  %876 = vmatpush.msra.mxu1 %v1845_v50  ;;  %2453 = vst [vmem:[#allocation31_spill] sm:$0xff] %v2086_v19 }
 0x296   :  { %896 = vmatpush.msra.mxu2 %v1848_v53  ;;  %916 = vmatpush.msra.mxu3 %v1851_v62 }
 0x297   :  { %857 = vmatpush.msra.mxu0 %v1854_v63  ;;  %877 = vmatpush.msra.mxu1 %v1857_v48 }
 0x298   :  { %897 = vmatpush.msra.mxu2 %v1860_v58  ;;  %917 = vmatpush.msra.mxu3 %v1863_v24 }
 0x299   :  { %858 = vmatpush.msra.mxu0 %v1866_v26  ;;  %878 = vmatpush.msra.mxu1 %v1869_v30 }
 0x29a   :  { %898 = vmatpush.msra.mxu2 %v1872_v46  ;;  %918 = vmatpush.msra.mxu3 %v1875_v42 }
 0x29b   :  { %859 = vmatpush.msra.mxu0 %v1878_v22  ;;  %879 = vmatpush.msra.mxu1 %v2431_v20 }
 0x29c   :  { %899 = vmatpush.msra.mxu2 %v2432_v21  ;;  %919 = vmatpush.msra.mxu3 %v2433_v60 }
 0x29d   :  { %860 = vmatpush.msra.mxu0 %v2434_v27  ;;  %880 = vmatpush.msra.mxu1 %v2435_v28 }
 0x29e   :  { %900 = vmatpush.msra.mxu2 %v1896_v61  ;;  %920 = vmatpush.msra.mxu3 %v2436_v31 }
 0x29f   :  { %861 = vmatpush.msra.mxu0 %v2437_v32  ;;  %881 = vmatpush.msra.mxu1 %v1905_v52 }
 0x2a0   :  { %901 = vmatpush.msra.mxu2 %v2438_v33  ;;  %921 = vmatpush.msra.mxu3 %v2439_v34 }
 0x2a1   :  { %862 = vmatpush.msra.mxu0 %v2004_v35  ;;  %882 = vmatpush.msra.mxu1 %v2007_v36 }
 0x2a2   :  { %902 = vmatpush.msra.mxu2 %v1916_v55  ;;  %922 = vmatpush.msra.mxu3 %v1919_v59 }
 0x2a3   :  { %863 = vmatpush.msra.mxu0 %v2012_v37  ;;  %883 = vmatpush.msra.mxu1 %v2015_v38 }
 0x2a4   :  { %903 = vmatpush.msra.mxu2 %v1924_v0  ;;  %923 = vmatpush.msra.mxu3 %v1927_v45 }
 0x2a5   :  { %864 = vmatpush.msra.mxu0 %v2020_v39  ;;  %884 = vmatpush.msra.mxu1 %v2023_v40 }
 0x2a6   :  { %904 = vmatpush.msra.mxu2 %v2026_v43  ;;  %924 = vmatpush.msra.mxu3 %v2029_v44 }
 0x2a7   :  { %865 = vmatpush.msra.mxu0 %v2032_v41  ;;  %885 = vmatpush.msra.mxu1 %v2035_v1 }
 0x2a8   :  { %905 = vmatpush.msra.mxu2 %v2038_v2  ;;  %925 = vmatpush.msra.mxu3 %v2041_v3 }
 0x2a9   :  { %866 = vmatpush.msra.mxu0 %v2044_v4  ;;  %886 = vmatpush.msra.mxu1 %v2047_v5 }
 0x2aa   :  { %906 = vmatpush.msra.mxu2 %v2050_v6  ;;  %926 = vmatpush.msra.mxu3 %v2053_v7 }
 0x2ab   :  { %867 = vmatpush.msra.mxu0 %v2056_v8  ;;  %887 = vmatpush.msra.mxu1 %v2059_v9 }
 0x2ac   :  { %907 = vmatpush.msra.mxu2 %v2062_v10  ;;  %927 = vmatpush.msra.mxu3 %v2065_v11 }
 0x2ad   :  { %868 = vmatpush.msra.mxu0 %v2068_v12  ;;  %888 = vmatpush.msra.mxu1 %v2071_v13  ;;  %v2089_v13 = vld [vmem:[#allocation2 + $0x58] sm:$0xff] }
 0x2ae   :  { %908 = vmatpush.msra.mxu2 %v2074_v14  ;;  %928 = vmatpush.msra.mxu3 %v2077_v16  ;;  %2454 = vst [vmem:[#allocation32_spill] sm:$0xff] %v2089_v13  ;;  %v2092_v14 = vld [vmem:[#allocation2 + $0x20] sm:$0xff]  ;;  %v2095_v16 = vld [vmem:[#allocation2 + $0x28] sm:$0xff] }
 0x2af   :  { %869 = vmatpush.msra.mxu0 %v2080_v17  ;;  %889 = vmatpush.msra.mxu1 %v2083_v18  ;;  %2455 = vst [vmem:[#allocation33_spill] sm:$0xff] %v2092_v14  ;;  %v2098_v17 = vld [vmem:[#allocation2 + $0x30] sm:$0xff]  ;;  %v2101_v18 = vld [vmem:[#allocation2 + $0x38] sm:$0xff] }
 0x2b0   :  { %909 = vmatpush.msra.mxu2 %v2086_v19  ;;  %929 = vmatpush.msra.mxu3 %v2089_v13  ;;  %2456 = vst [vmem:[#allocation5_spill] sm:$0xff] %v2095_v16  ;;  %v2104_v19 = vld [vmem:[#allocation2] sm:$0xff]  ;;  %v2107_v13 = vld [vmem:[#allocation2 + $0x8] sm:$0xff] }
 0x2b1   :  { %870 = vmatpush.msra.mxu0 %v2092_v14  ;;  %890 = vmatpush.msra.mxu1 %v2095_v16  ;;  %2457 = vst [vmem:[#allocation6_spill] sm:$0xff] %v2098_v17  ;;  %v2110_v14 = vld [vmem:[#allocation2 + $0x10] sm:$0xff]  ;;  %v2113_v16 = vld [vmem:[#allocation2 + $0x18] sm:$0xff] }
 0x2b2   :  { %910 = vmatpush.msra.mxu2 %v2098_v17  ;;  %2458 = vst [vmem:[#allocation9_spill] sm:$0xff] %v2101_v18  ;;  %930 = vmatpush.msra.mxu3 %v2101_v18  ;;  %v614_v17 = vpop.permute.xlu2 %613 }
 0x2b3   :  { %2459 = vst [vmem:[#allocation10_spill] sm:$0xff] %v2104_v19  ;;  %871 = vmatpush.msra.mxu0 %v2104_v19  ;;  %891 = vmatpush.msra.mxu1 %v2107_v13  ;;  %v616_v12 = vmul.f32 %v614_v17, %v2415_v23  ;;  %v617_v18 = vmul.f32 %v614_v17, %v2416_v25 }
 0x2b4   :  { %2460 = vst [vmem:[#allocation7_spill] sm:$0xff] %v2107_v13  ;;  %911 = vmatpush.msra.mxu2 %v2110_v14  ;;  %931 = vmatpush.msra.mxu3 %v2113_v16  ;;  %v618_v7 = vmul.f32 %v614_v17, %v2419_v54 }
 0x2b5   :  { %2461 = vst [vmem:[#allocation8_spill] sm:$0xff] %v2110_v14  ;;  %v620_v11 = vadd.f32 %v616_v12, %v2417_v29  ;;  %v621_v19 = vadd.f32 %v617_v18, %v2418_v51  ;;  %v619_v14 = vmul.f32 %v614_v17, %v2420_v56 }
 0x2b6   :  { %2462 = vst [vmem:[#allocation13_spill] sm:$0xff] %v2113_v16  ;;  %v622_v16 = vadd.f32 %v618_v7, %v2421_v57 }
 0x2b7   :  { %v623_v23 = vadd.f32 %v619_v14, %v1674_v49 }
 0x310   :  { %v641_v10 = vpop.f32.mrf.mxu0  ;;  %v661_v9 = vpop.f32.mrf.mxu1 }
 0x311   :  { %v704_v13 = vadd.f32 %v641_v10, %v620_v11  ;;  %v705_v8 = vadd.f32 %v661_v9, %v621_v19 }
 0x313   :  { %1150 = vtanh.f32 %v704_v13 }
 0x314   :  { %1152 = vtanh.f32 %v705_v8 }
 0x317   :  { %v681_v6 = vpop.f32.mrf.mxu2  ;;  %v701_v25 = vpop.f32.mrf.mxu3 }
 0x318   :  { %v706_v5 = vadd.f32 %v681_v6, %v622_v16  ;;  %v707_v29 = vadd.f32 %v701_v25, %v623_v23  ;;  %v2463_v25 = vld [vmem:[#allocation12_spill] sm:$0xff] }
 0x319   :  { %v1151_v12 = vpop.eup %1150 }
 0x31a   :  { %v1153_v18 = vpop.eup %1152  ;;  %1154 = vtanh.f32 %v706_v5  ;;  %v712_v51 = vmul.f32 0.5, %v1151_v12 }
 0x31b   :  { %v713_v10 = vmul.f32 0.5, %v1153_v18  ;;  %1156 = vtanh.f32 %v707_v29  ;;  %v2464_v29 = vld [vmem:[#allocation17_spill] sm:$0xff] }
 0x31c   :  { %v716_v11 = vadd.f32 0.5, %v712_v51  ;;  %v2465_v51 = vld [vmem:[#allocation18_spill] sm:$0xff] }
 0x31d   :  { %v717_v9 = vadd.f32 0.5, %v713_v10 }
 0x31f   :  { %v720_v17 = vmul.f32 %v717_v9, %v1977_v15  ;;  %v2485_v15 = vld [vmem:[#allocation13_spill] sm:$0xff] }
 0x320   :  { %v1155_v13 = vpop.eup %1154 }
 0x321   :  { %v721_v8 = vmul.f32 %v1155_v13, %v716_v11  ;;  %v1157_v19 = vpop.eup %1156 }
 0x322   :  { %v715_v14 = vmul.f32 0.5, %v1157_v19 }
 0x323   :  { %v2125_v7 = vadd.f32 %v721_v8, %v720_v17 }
 0x324   :  { %v719_v6 = vadd.f32 0.5, %v715_v14 }
 0x325   :  { %1158 = vtanh.f32 %v2125_v7 }
 0x32b   :  { %v1159_v16 = vpop.eup %1158 }
 0x32c   :  { %v724_v23 = vmul.f32 %v1159_v16, %v719_v6 }
 0x32e   :  { %756 = vmatmul.f32.vlgmr.msrb.gmra.mxu0 %v724_v23  ;;  %776 = vmatmul.f32.vlgmr.msrb.gmra.mxu1 %v724_v23 }
 0x32f   :  { %796 = vmatmul.f32.vlgmr.msrb.gmra.mxu2 %v724_v23  ;;  %816 = vmatmul.f32.vlgmr.msrb.gmra.mxu3 %v724_v23 }
 0x330   :  { %972 = vmatpush.msrb.mxu0 %v1842_v47  ;;  %992 = vmatpush.msrb.mxu1 %v1845_v50  ;;  %v2466_v47 = vld [vmem:[#allocation15_spill] sm:$0xff]  ;;  %v2467_v50 = vld [vmem:[#allocation16_spill] sm:$0xff] }
 0x331   :  { %1012 = vmatpush.msrb.mxu2 %v1848_v53  ;;  %1032 = vmatpush.msrb.mxu3 %v1851_v62  ;;  %v2468_v53 = vld [vmem:[#allocation21_spill] sm:$0xff]  ;;  %v2469_v62 = vld [vmem:[#allocation22_spill] sm:$0xff] }
 0x332   :  { %973 = vmatpush.msrb.mxu0 %v1854_v63  ;;  %993 = vmatpush.msrb.mxu1 %v1857_v48  ;;  %v2470_v63 = vld [vmem:[#allocation19_spill] sm:$0xff]  ;;  %v2471_v48 = vld [vmem:[#allocation20_spill] sm:$0xff] }
 0x333   :  { %1013 = vmatpush.msrb.mxu2 %v1860_v58  ;;  %1033 = vmatpush.msrb.mxu3 %v1863_v24  ;;  %v2472_v58 = vld [vmem:[#allocation25_spill] sm:$0xff]  ;;  %v2473_v24 = vld [vmem:[#allocation26_spill] sm:$0xff] }
 0x334   :  { %974 = vmatpush.msrb.mxu0 %v1866_v26  ;;  %994 = vmatpush.msrb.mxu1 %v1869_v30  ;;  %v2474_v26 = vld [vmem:[#allocation23_spill] sm:$0xff]  ;;  %v2475_v30 = vld [vmem:[#allocation24_spill] sm:$0xff] }
 0x335   :  { %1014 = vmatpush.msrb.mxu2 %v1872_v46  ;;  %1034 = vmatpush.msrb.mxu3 %v1875_v42  ;;  %v2476_v46 = vld [vmem:[#allocation31_spill] sm:$0xff]  ;;  %v2477_v42 = vld [vmem:[#allocation32_spill] sm:$0xff] }
 0x336   :  { %975 = vmatpush.msrb.mxu0 %v1878_v22  ;;  %995 = vmatpush.msrb.mxu1 %v2431_v20  ;;  %v2478_v22 = vld [vmem:[#allocation33_spill] sm:$0xff]  ;;  %v730_v20 = vpop.permute.xlu2 %729 }
 0x337   :  { %1015 = vmatpush.msrb.mxu2 %v2432_v21  ;;  %1035 = vmatpush.msrb.mxu3 %v2433_v60  ;;  %v2486_v21 = vld [vmem:[#allocation27_spill] sm:$0xff] }
 0x338   :  { %976 = vmatpush.msrb.mxu0 %v2434_v27  ;;  %996 = vmatpush.msrb.mxu1 %v2435_v28  ;;  %v732_v60 = vmul.f32 %v730_v20, %v2486_v21  ;;  %v2487_v27 = vld [vmem:[#allocation28_spill] sm:$0xff] }
 0x339   :  { %1016 = vmatpush.msrb.mxu2 %v1896_v61  ;;  %1036 = vmatpush.msrb.mxu3 %v2436_v31  ;;  %v2484_v61 = vld [vmem:[#allocation8_spill] sm:$0xff]  ;;  %v733_v28 = vmul.f32 %v730_v20, %v2487_v27  ;;  %v2488_v31 = vld [vmem:[#allocation29_spill] sm:$0xff] }
 0x33a   :  { %977 = vmatpush.msrb.mxu0 %v2437_v32  ;;  %997 = vmatpush.msrb.mxu1 %v1905_v52  ;;  %v2481_v52 = vld [vmem:[#allocation9_spill] sm:$0xff]  ;;  %v736_v32 = vadd.f32 %v732_v60, %v2488_v31 }
 0x33b   :  { %1017 = vmatpush.msrb.mxu2 %v2438_v33  ;;  %1037 = vmatpush.msrb.mxu3 %v2439_v34  ;;  %v2489_v33 = vld [vmem:[#allocation30_spill] sm:$0xff] }
 0x33c   :  { %978 = vmatpush.msrb.mxu0 %v2004_v35  ;;  %998 = vmatpush.msrb.mxu1 %v2007_v36  ;;  %v737_v34 = vadd.f32 %v733_v28, %v2489_v33 }
 0x33d   :  { %1018 = vmatpush.msrb.mxu2 %v1916_v55  ;;  %1038 = vmatpush.msrb.mxu3 %v1919_v59  ;;  %v2479_v55 = vld [vmem:[#allocation5_spill] sm:$0xff]  ;;  %v2480_v59 = vld [vmem:[#allocation6_spill] sm:$0xff] }
 0x33e   :  { %979 = vmatpush.msrb.mxu0 %v2012_v37  ;;  %999 = vmatpush.msrb.mxu1 %v2015_v38 }
 0x33f   :  { %1019 = vmatpush.msrb.mxu2 %v1924_v0  ;;  %1039 = vmatpush.msrb.mxu3 %v1927_v45  ;;  %v2482_v0 = vld [vmem:[#allocation10_spill] sm:$0xff]  ;;  %v2483_v45 = vld [vmem:[#allocation7_spill] sm:$0xff] }
 0x340   :  { %980 = vmatpush.msrb.mxu0 %v2020_v39  ;;  %1000 = vmatpush.msrb.mxu1 %v2023_v40  ;;  %v734_v39 = vmul.f32 %v730_v20, %v2419_v54  ;;  %v735_v40 = vmul.f32 %v730_v20, %v2420_v56 }
 0x341   :  { %1020 = vmatpush.msrb.mxu2 %v2026_v43  ;;  %1040 = vmatpush.msrb.mxu3 %v2029_v44 }
 0x342   :  { %981 = vmatpush.msrb.mxu0 %v2032_v41  ;;  %1001 = vmatpush.msrb.mxu1 %v2035_v1  ;;  %v738_v43 = vadd.f32 %v734_v39, %v2421_v57  ;;  %v739_v41 = vadd.f32 %v735_v40, %v1674_v49 }
 0x343   :  { %1021 = vmatpush.msrb.mxu2 %v2038_v2  ;;  %1041 = vmatpush.msrb.mxu3 %v2041_v3 }
 0x344   :  { %982 = vmatpush.msrb.mxu0 %v2044_v4  ;;  %1002 = vmatpush.msrb.mxu1 %v2463_v25  ;;  %v846_v25 = vpop.permute.xlu0 %845 }
 0x345   :  { %1022 = vmatpush.msrb.mxu2 %v2464_v29  ;;  %1042 = vmatpush.msrb.mxu3 %v2465_v51  ;;  %v848_v29 = vmul.f32 %v846_v25, %v2486_v21  ;;  %v849_v51 = vmul.f32 %v846_v25, %v2487_v27 }
 0x346   :  { %983 = vmatpush.msrb.mxu0 %v2466_v47  ;;  %1003 = vmatpush.msrb.mxu1 %v2467_v50 }
 0x347   :  { %1023 = vmatpush.msrb.mxu2 %v2468_v53  ;;  %1043 = vmatpush.msrb.mxu3 %v2469_v62  ;;  %v852_v47 = vadd.f32 %v848_v29, %v2488_v31 }
 0x348   :  { %984 = vmatpush.msrb.mxu0 %v2470_v63  ;;  %1004 = vmatpush.msrb.mxu1 %v2471_v48  ;;  %v850_v48 = vmul.f32 %v846_v25, %v2419_v54 }
 0x349   :  { %1024 = vmatpush.msrb.mxu2 %v2472_v58  ;;  %1044 = vmatpush.msrb.mxu3 %v2473_v24  ;;  %v851_v58 = vmul.f32 %v846_v25, %v2420_v56 }
 0x34a   :  { %985 = vmatpush.msrb.mxu0 %v2474_v26  ;;  %1005 = vmatpush.msrb.mxu1 %v2475_v30  ;;  %v854_v24 = vadd.f32 %v850_v48, %v2421_v57 }
 0x34b   :  { %1025 = vmatpush.msrb.mxu2 %v2476_v46  ;;  %1045 = vmatpush.msrb.mxu3 %v2477_v42  ;;  %v855_v30 = vadd.f32 %v851_v58, %v1674_v49 }
 0x34c   :  { %986 = vmatpush.msrb.mxu0 %v2478_v22  ;;  %1006 = vmatpush.msrb.mxu1 %v2479_v55 }
 0x34d   :  { %1026 = vmatpush.msrb.mxu2 %v2480_v59  ;;  %1046 = vmatpush.msrb.mxu3 %v2481_v52 }
 0x34e   :  { %987 = vmatpush.msrb.mxu0 %v2482_v0  ;;  %1007 = vmatpush.msrb.mxu1 %v2483_v45 }
 0x34f   :  { %1027 = vmatpush.msrb.mxu2 %v2484_v61  ;;  %1047 = vmatpush.msrb.mxu3 %v2485_v15 }
 0x3ab   :  { %v757_v35 = vpop.f32.mrf.mxu0  ;;  %v777_v36 = vpop.f32.mrf.mxu1 }
 0x3ac   :  { %v820_v37 = vadd.f32 %v757_v35, %v736_v32  ;;  %v821_v38 = vadd.f32 %v777_v36, %v737_v34 }
 0x3ae   :  { %1160 = vtanh.f32 %v820_v37 }
 0x3af   :  { %1162 = vtanh.f32 %v821_v38  ;;  %v962_v38 = vpop.permute.xlu1 %961 }
 0x3b0   :  { %v964_v39 = vmul.f32 %v962_v38, %v2486_v21  ;;  %v965_v40 = vmul.f32 %v962_v38, %v2487_v27 }
 0x3b2   :  { %v797_v44 = vpop.f32.mrf.mxu2  ;;  %v817_v1 = vpop.f32.mrf.mxu3 }
 0x3b3   :  { %v822_v2 = vadd.f32 %v797_v44, %v738_v43  ;;  %v823_v4 = vadd.f32 %v817_v1, %v739_v41  ;;  %v968_v43 = vadd.f32 %v964_v39, %v2488_v31  ;;  %v969_v44 = vadd.f32 %v965_v40, %v2489_v33 }
 0x3b4   :  { %v1161_v3 = vpop.eup %1160 }
 0x3b5   :  { %v1163_v5 = vpop.eup %1162  ;;  %1164 = vtanh.f32 %v822_v2  ;;  %v828_v12 = vmul.f32 0.5, %v1161_v3 }
 0x3b6   :  { %v829_v18 = vmul.f32 0.5, %v1163_v5  ;;  %1166 = vtanh.f32 %v823_v4  ;;  %v966_v4 = vmul.f32 %v962_v38, %v2419_v54  ;;  %v967_v5 = vmul.f32 %v962_v38, %v2420_v56 }
 0x3b7   :  { %v832_v9 = vadd.f32 0.5, %v828_v12 }
 0x3b8   :  { %v833_v10 = vadd.f32 0.5, %v829_v18  ;;  %v970_v12 = vadd.f32 %v966_v4, %v2421_v57  ;;  %v971_v21 = vadd.f32 %v967_v5, %v1674_v49  ;;  %v1109_v49 = vld [vmem:[%s2227_s4] ss:$0 sm:$0xff] }
 0x3ba   :  { %v836_v13 = vmul.f32 %v833_v10, %v2125_v7  ;;  %v853_v7 = vadd.f32 %v849_v51, %v2489_v33 }
 0x3bb   :  { %v1165_v11 = vpop.eup %1164 }
 0x3bc   :  { %v837_v17 = vmul.f32 %v1165_v11, %v832_v9  ;;  %v1167_v8 = vpop.eup %1166 }
 0x3bd   :  { %v831_v14 = vmul.f32 0.5, %v1167_v8 }
 0x3be   :  { %v838_v19 = vadd.f32 %v837_v17, %v836_v13 }
 0x3bf   :  { %v835_v6 = vadd.f32 0.5, %v831_v14 }
 0x3c0   :  { %1168 = vtanh.f32 %v838_v19 }
 0x3c6   :  { %v1169_v16 = vpop.eup %1168 }
 0x3c7   :  { %v840_v23 = vmul.f32 %v1169_v16, %v835_v6 }
 0x3c9   :  { %872 = vmatmul.f32.vlgmr.msra.gmra.mxu0 %v840_v23  ;;  %892 = vmatmul.f32.vlgmr.msra.gmra.mxu1 %v840_v23 }
 0x3ca   :  { %912 = vmatmul.f32.vlgmr.msra.gmra.mxu2 %v840_v23  ;;  %932 = vmatmul.f32.vlgmr.msra.gmra.mxu3 %v840_v23 }
 0x446   :  { %v873_v50 = vpop.f32.mrf.mxu0  ;;  %v893_v53 = vpop.f32.mrf.mxu1 }
 0x447   :  { %v936_v62 = vadd.f32 %v873_v50, %v852_v47  ;;  %v937_v63 = vadd.f32 %v893_v53, %v853_v7 }
 0x449   :  { %1170 = vtanh.f32 %v936_v62 }
 0x44a   :  { %1172 = vtanh.f32 %v937_v63 }
 0x44d   :  { %v913_v26 = vpop.f32.mrf.mxu2  ;;  %v933_v46 = vpop.f32.mrf.mxu3 }
 0x44e   :  { %v938_v42 = vadd.f32 %v913_v26, %v854_v24  ;;  %v939_v55 = vadd.f32 %v933_v46, %v855_v30 }
 0x44f   :  { %v1171_v22 = vpop.eup %1170 }
 0x450   :  { %v1173_v59 = vpop.eup %1172  ;;  %1174 = vtanh.f32 %v938_v42  ;;  %v944_v52 = vmul.f32 0.5, %v1171_v22 }
 0x451   :  { %v945_v0 = vmul.f32 0.5, %v1173_v59  ;;  %1176 = vtanh.f32 %v939_v55 }
 0x452   :  { %v948_v61 = vadd.f32 0.5, %v944_v52 }
 0x453   :  { %v949_v45 = vadd.f32 0.5, %v945_v0 }
 0x455   :  { %v952_v20 = vmul.f32 %v949_v45, %v838_v19 }
 0x456   :  { %v1175_v15 = vpop.eup %1174 }
 0x457   :  { %v953_v60 = vmul.f32 %v1175_v15, %v948_v61  ;;  %v1177_v28 = vpop.eup %1176 }
 0x458   :  { %v947_v34 = vmul.f32 0.5, %v1177_v28 }
 0x459   :  { %v954_v32 = vadd.f32 %v953_v60, %v952_v20 }
 0x45a   :  { %v951_v35 = vadd.f32 0.5, %v947_v34 }
 0x45b   :  { %1178 = vtanh.f32 %v954_v32 }
 0x461   :  { %v1179_v36 = vpop.eup %1178 }
 0x462   :  { %v956_v37 = vmul.f32 %v1179_v36, %v951_v35 }
 0x464   :  { %988 = vmatmul.f32.vlgmr.msrb.gmra.mxu0 %v956_v37  ;;  %1008 = vmatmul.f32.vlgmr.msrb.gmra.mxu1 %v956_v37 }
 0x465   :  { %1028 = vmatmul.f32.vlgmr.msrb.gmra.mxu2 %v956_v37  ;;  %1048 = vmatmul.f32.vlgmr.msrb.gmra.mxu3 %v956_v37 }
 0x4e1   :  { %v989_v41 = vpop.f32.mrf.mxu0  ;;  %v1009_v1 = vpop.f32.mrf.mxu1 }
 0x4e2   :  { %v1052_v2 = vadd.f32 %v989_v41, %v968_v43  ;;  %v1053_v3 = vadd.f32 %v1009_v1, %v969_v44 }
 0x4e4   :  { %1180 = vtanh.f32 %v1052_v2 }
 0x4e5   :  { %1182 = vtanh.f32 %v1053_v3 }
 0x4e8   :  { %v1029_v18 = vpop.f32.mrf.mxu2  ;;  %v1049_v27 = vpop.f32.mrf.mxu3 }
 0x4e9   :  { %v1054_v10 = vadd.f32 %v1029_v18, %v970_v12  ;;  %v1055_v9 = vadd.f32 %v1049_v27, %v971_v21 }
 0x4ea   :  { %v1181_v31 = vpop.eup %1180 }
 0x4eb   :  { %v1183_v33 = vpop.eup %1182  ;;  %1184 = vtanh.f32 %v1054_v10  ;;  %v1060_v11 = vmul.f32 0.5, %v1181_v31 }
 0x4ec   :  { %v1061_v13 = vmul.f32 0.5, %v1183_v33  ;;  %1186 = vtanh.f32 %v1055_v9 }
 0x4ed   :  { %v1064_v54 = vadd.f32 0.5, %v1060_v11 }
 0x4ee   :  { %v1065_v17 = vadd.f32 0.5, %v1061_v13 }
 0x4f0   :  { %v1068_v56 = vmul.f32 %v1065_v17, %v954_v32 }
 0x4f1   :  { %v1185_v8 = vpop.eup %1184 }
 0x4f2   :  { %v1069_v19 = vmul.f32 %v1185_v8, %v1064_v54  ;;  %v1187_v14 = vpop.eup %1186 }
 0x4f3   :  { %v1063_v57 = vmul.f32 0.5, %v1187_v14 }
 0x4f4   :  { %v1070_v6 = vadd.f32 %v1069_v19, %v1068_v56 }
 0x4f5   :  { %v1067_v16 = vadd.f32 0.5, %v1063_v57 }
 0x4f6   :  { %1188 = vtanh.f32 %v1070_v6 }
 0x4fc   :  { %v1189_v23 = vpop.eup %1188 }
 0x4fd   :  { %v1072_v25 = vmul.f32 %v1189_v23, %v1067_v16 }
 0x4ff   :  { %v1076_v29 = vmul.f32 %v1109_v49, %v1072_v25 }
 0x501   :  { %v1078_v51 = vsel %vm1077_vm0, %v1076_v29, 0.0 }
 0x502   :  { %1079 = vadd.xlane.f32.xlu2 %v1078_v51 }
 0x575   :  { %v1080_v47 = vpop.xlane.xlu2 %1079 }
 0x576   :  { %v1081_v7 = vadd.f32 %v1109_v49, %v1080_v47 }
 0x578   :  { %1083 = vrot.lane.b32.xlu0 %v1081_v7, %s1285_s18 }
 0x5ea   :  { %v1084_v50 = vpop.permute.xlu0 %1083 }
 0x5eb   :  { %1087 = vst.msk [vmem:[%s2228_s5] sm:$0x3] %vm1086_vm1, %v1084_v50 }
 0x5ec   :  { %1092 = vsyncpa [#allocation3], 1 }

</bundles_post_ra>
